<compile_context>
chip_gen: v6e
topology: v6e:2x2x1
jax: 0.10.0
libtpu: 0.0.40
codegen_flags: <defaults>
</compile_context>

<pallas_src>
import math
import functools

import jax
import jax.numpy as jnp
from jax import lax
from jax.experimental import pallas as pl
from jax.experimental.pallas import tpu as pltpu

EPS = 1e-5
NEG_INF = -1.0e9


def _encoder_kernel(x_full_ref, xq_ref, mask_ref,
                    wq_ref, wk_ref, wv_ref, wo_ref,
                    w1_ref, b1_ref, w2_ref, b2_ref,
                    g1_ref, be1_ref, g2_ref, be2_ref,
                    out_ref,
                    k_scratch, v_scratch,
                    *, num_heads: int):
    t = pl.program_id(1)

    # ---- K/V projections: computed once per batch element, cached in VMEM
    #      scratch across query tiles (q-tile grid axis is "arbitrary"). ----
    @pl.when(t == 0)
    def _():
        x_full = x_full_ref[0].astype(jnp.bfloat16)                       # [T, D]
        for h in range(num_heads):                                        # static unroll
            k_scratch[h] = jnp.dot(
                x_full, wk_ref[h],
                preferred_element_type=jnp.float32).astype(jnp.bfloat16)  # [T, ph]
            v_scratch[h] = jnp.dot(
                x_full, wv_ref[h],
                preferred_element_type=jnp.float32).astype(jnp.bfloat16)  # [T, ph]

    # Query tile for this grid step (pipelined [1, tq, D] block).
    x_q = xq_ref[0]                                                       # [tq, D] f32
    x_q_bf = x_q.astype(jnp.bfloat16)
    tq, D = x_q.shape

    # Mask bias hoisted out of the head loop: 0 where kept, -1e9 where masked.
    bias = jnp.where(mask_ref[0] == 0.0, NEG_INF, 0.0).astype(jnp.float32)  # [1, T]

    # ---- Multi-head attention with head-major weights (no lane slice/concat).
    #      Attention scale is already folded into wq by the wrapper. ----
    attn = jnp.zeros((tq, D), jnp.float32)
    for h in range(num_heads):                                            # static unroll
        qh = jnp.dot(x_q_bf, wq_ref[h],
                     preferred_element_type=jnp.float32)                  # [tq, ph]
        kh = k_scratch[h]                                                 # [T, ph] bf16
        vh = v_scratch[h]                                                 # [T, ph] bf16
        # q @ k^T without materializing a transpose (contract last dims).
        s = lax.dot_general(qh.astype(jnp.bfloat16), kh,
                            dimension_numbers=(((1,), (1,)), ((), ())),
                            preferred_element_type=jnp.float32)           # [tq, T]
        s = s + bias
        m = jnp.max(s, axis=-1, keepdims=True)
        p = jnp.exp(s - m)
        p = p * pl.reciprocal(jnp.sum(p, axis=-1, keepdims=True), approx=True)
        ho = jnp.dot(p.astype(jnp.bfloat16), vh,
                     preferred_element_type=jnp.float32)                  # [tq, ph]
        # Output projection accumulated per head: sum_h ho_h @ wo_h.
        attn = attn + jnp.dot(ho.astype(jnp.bfloat16), wo_ref[h],
                              preferred_element_type=jnp.float32)         # [tq, D]

    # ---- Add & LayerNorm 1 (dropout p=0 -> identity); stats in f32 ----
    add1 = x_q + attn
    mu1 = jnp.mean(add1, axis=-1, keepdims=True)
    var1 = jnp.mean((add1 - mu1) ** 2, axis=-1, keepdims=True)
    ln1 = (add1 - mu1) * lax.rsqrt(var1 + EPS) * g1_ref[...] + be1_ref[...]

    # ---- Feed-forward network (bf16 MXU operands, f32 accumulation) ----
    h1 = jnp.dot(ln1.astype(jnp.bfloat16), w1_ref[...],
                 preferred_element_type=jnp.float32) + b1_ref[...]
    h1 = jnp.maximum(h1, 0.0)
    ff = jnp.dot(h1.astype(jnp.bfloat16), w2_ref[...],
                 preferred_element_type=jnp.float32) + b2_ref[...]

    # ---- Add & LayerNorm 2 ----
    add2 = ln1 + ff
    mu2 = jnp.mean(add2, axis=-1, keepdims=True)
    var2 = jnp.mean((add2 - mu2) ** 2, axis=-1, keepdims=True)
    ln2 = (add2 - mu2) * lax.rsqrt(var2 + EPS) * g2_ref[...] + be2_ref[...]

    out_ref[0] = ln2.astype(out_ref.dtype)


def _choose_q_tile(T: int) -> int:
    """Query-tile size: bounded at 256 rows; must divide T (multiple of 8)."""
    if T <= 256:
        return T
    for tq in (256, 128, 64, 32, 16, 8):
        if T % tq == 0:
            return tq
    return T


def encoder_block(x, mask, params, *, num_heads: int):
    """x: [B, T, D] float32, mask: [B, 1, T] float32 (0 = masked out).

    params use the "x @ W" orientation (PyTorch Linear weight transposed).
    """
    B, T, D = x.shape
    F = params["w1"].shape[1]
    assert D % num_heads == 0
    ph = D // num_heads
    scale = 1.0 / math.sqrt(ph)
    tq = _choose_q_tile(T)
    nq = T // tq

    # Head-major, bf16 weights (in production these would be pre-converted once
    # and stored bf16 in HBM to halve weight DMA).  Attention scale folded into wq.
    bf = jnp.bfloat16
    wq = (params["wq"] * scale).reshape(D, num_heads, ph).transpose(1, 0, 2).astype(bf)
    wk = params["wk"].reshape(D, num_heads, ph).transpose(1, 0, 2).astype(bf)   # [H, D, ph]
    wv = params["wv"].reshape(D, num_heads, ph).transpose(1, 0, 2).astype(bf)
    wo = params["wo"].reshape(num_heads, ph, D).astype(bf)                      # [H, ph, D]
    w1 = params["w1"].astype(bf)
    w2 = params["w2"].astype(bf)

    const = lambda shape: pl.BlockSpec(shape, lambda b, t: tuple(0 for _ in shape))

    kernel = functools.partial(_encoder_kernel, num_heads=num_heads)
    return pl.pallas_call(
        kernel,
        out_shape=jax.ShapeDtypeStruct((B, T, D), x.dtype),
        grid_spec=pltpu.PrefetchScalarGridSpec(
            num_scalar_prefetch=0,
            grid=(B, nq),
            in_specs=[
                pl.BlockSpec((1, T, D), lambda b, t: (b, 0, 0)),    # x (full sequence, K/V)
                pl.BlockSpec((1, tq, D), lambda b, t: (b, t, 0)),   # x (query tile / residual)
                pl.BlockSpec((1, 1, T), lambda b, t: (b, 0, 0)),    # mask (keys)
                const((num_heads, D, ph)),                          # wq (head-major, scaled)
                const((num_heads, D, ph)),                          # wk
                const((num_heads, D, ph)),                          # wv
                const((num_heads, ph, D)),                          # wo
                const((D, F)),                                      # w1
                const((1, F)),                                      # b1
                const((F, D)),                                      # w2
                const((1, D)),                                      # b2
                const((1, D)),                                      # gamma1
                const((1, D)),                                      # beta1
                const((1, D)),                                      # gamma2
                const((1, D)),                                      # beta2
            ],
            out_specs=pl.BlockSpec((1, tq, D), lambda b, t: (b, t, 0)),
            scratch_shapes=[
                pltpu.VMEM((num_heads, T, ph), jnp.bfloat16),       # K cache (all heads)
                pltpu.VMEM((num_heads, T, ph), jnp.bfloat16),       # V cache (all heads)
            ],
        ),
        compiler_params=pltpu.CompilerParams(
            dimension_semantics=("parallel", "arbitrary"),
            vmem_limit_bytes=48 * 1024 * 1024,
        ),
    )(x, x, mask,
      wq, wk, wv, wo,
      w1, params["b1"], w2, params["b2"],
      params["gamma1"], params["beta1"], params["gamma2"], params["beta2"])


def _reference(x, mask, params, *, num_heads):
    """Pure-JAX f32 reference mirroring the PyTorch forward (for validation)."""
    B, T, D = x.shape
    ph = D // num_heads
    q = x @ params["wq"]
    k = x @ params["wk"]
    v = x @ params["wv"]
    split = lambda t: t.reshape(B, T, num_heads, ph).transpose(0, 2, 1, 3)
    q, k, v = split(q), split(k), split(v)
    w = jnp.einsum("bhqd,bhkd->bhqk", q, k) / math.sqrt(ph)
    m = mask[:, None, :, :]                       # [B,1,1,T]
    w = jnp.where(m == 0.0, -1.0e9, w)
    w = jax.nn.softmax(w, axis=-1)
    wv = jnp.einsum("bhqk,bhkd->bhqd", w, v).transpose(0, 2, 1, 3).reshape(B, T, D)
    attn = wv @ params["wo"]

    def layernorm(y, g, b):
        mu = jnp.mean(y, axis=-1, keepdims=True)
        var = jnp.mean((y - mu) ** 2, axis=-1, keepdims=True)
        return (y - mu) / jnp.sqrt(var + EPS) * g + b

    add1 = layernorm(x + attn, params["gamma1"][0], params["beta1"][0])
    ff = jnp.maximum(add1 @ params["w1"] + params["b1"][0], 0.0) @ params["w2"] + params["b2"][0]
    return layernorm(add1 + ff, params["gamma2"][0], params["beta2"][0])


if __name__ == "__main__":
    B, T, D, F, H = 2, 8, 32, 64, 4

    key = jax.random.PRNGKey(0)
    keys = jax.random.split(key, 10)
    sc = 0.1
    params = {
        "wq": jax.random.normal(keys[0], (D, D), jnp.float32) * sc,
        "wk": jax.random.normal(keys[1], (D, D), jnp.float32) * sc,
        "wv": jax.random.normal(keys[2], (D, D), jnp.float32) * sc,
        "wo": jax.random.normal(keys[3], (D, D), jnp.float32) * sc,
        "w1": jax.random.normal(keys[4], (D, F), jnp.float32) * sc,
        "b1": jax.random.normal(keys[5], (1, F), jnp.float32) * sc,
        "w2": jax.random.normal(keys[6], (F, D), jnp.float32) * sc,
        "b2": jax.random.normal(keys[7], (1, D), jnp.float32) * sc,
        "gamma1": jnp.ones((1, D), jnp.float32),
        "beta1": jnp.zeros((1, D), jnp.float32),
        "gamma2": jnp.ones((1, D), jnp.float32),
        "beta2": jnp.zeros((1, D), jnp.float32),
    }

    x = jax.random.normal(keys[8], (B, T, D), jnp.float32)
    # mask: last two key positions of batch 1 are masked out
    mask = jnp.ones((B, 1, T), jnp.float32)
    mask = mask.at[1, 0, T - 2:].set(0.0)

    out = encoder_block(x, mask, params, num_heads=H)
    out = jax.block_until_ready(out)

    ref = _reference(x, mask, params, num_heads=H)
    assert out.shape == (B, T, D)
    # bf16 MXU operands (f32 accumulation) -> loosened tolerance vs. f32 reference.
    assert jnp.allclose(out, ref, atol=5e-2, rtol=5e-2), "mismatch vs reference"

    print("KERNEL_OK")
</pallas_src>

<mosaic_0001>
module attributes {stable_mosaic.version = 11 : i64} {
  func.func @_encoder_kernel(%arg0: i32, %arg1: i32, %arg2: memref<1x8x32xf32, #tpu.memory_space<vmem>>, %arg3: memref<1x8x32xf32, #tpu.memory_space<vmem>>, %arg4: memref<1x1x8xf32, #tpu.memory_space<vmem>>, %arg5: memref<4x32x8xbf16, #tpu.memory_space<vmem>>, %arg6: memref<4x32x8xbf16, #tpu.memory_space<vmem>>, %arg7: memref<4x32x8xbf16, #tpu.memory_space<vmem>>, %arg8: memref<4x8x32xbf16, #tpu.memory_space<vmem>>, %arg9: memref<32x64xbf16, #tpu.memory_space<vmem>>, %arg10: memref<1x64xf32, #tpu.memory_space<vmem>>, %arg11: memref<64x32xbf16, #tpu.memory_space<vmem>>, %arg12: memref<1x32xf32, #tpu.memory_space<vmem>>, %arg13: memref<1x32xf32, #tpu.memory_space<vmem>>, %arg14: memref<1x32xf32, #tpu.memory_space<vmem>>, %arg15: memref<1x32xf32, #tpu.memory_space<vmem>>, %arg16: memref<1x32xf32, #tpu.memory_space<vmem>>, %arg17: memref<1x8x32xf32, #tpu.memory_space<vmem>>, %arg18: memref<4x8x8xbf16, #tpu.memory_space<vmem>>, %arg19: memref<4x8x8xbf16, #tpu.memory_space<vmem>>) attributes {dimension_semantics = [#tpu.dimension_semantics<parallel>, #tpu.dimension_semantics<arbitrary>], iteration_bounds = array<i64: 2, 1>, scalar_prefetch = 0 : i64, scratch_operands = 2 : i64, tpu.core_type = #tpu.core_type<tc>, window_params = [{transform_indices = @transform_0, window_bounds = array<i64: 1, 8, 32>}, {transform_indices = @transform_1, window_bounds = array<i64: 1, 8, 32>}, {transform_indices = @transform_2, window_bounds = array<i64: 1, 1, 8>}, {pipeline_mode = #tpu.pipeline_mode<synchronous>, transform_indices = @transform_3, window_bounds = array<i64: 4, 32, 8>}, {pipeline_mode = #tpu.pipeline_mode<synchronous>, transform_indices = @transform_4, window_bounds = array<i64: 4, 32, 8>}, {pipeline_mode = #tpu.pipeline_mode<synchronous>, transform_indices = @transform_5, window_bounds = array<i64: 4, 32, 8>}, {pipeline_mode = #tpu.pipeline_mode<synchronous>, transform_indices = @transform_6, window_bounds = array<i64: 4, 8, 32>}, {pipeline_mode = #tpu.pipeline_mode<synchronous>, transform_indices = @transform_7, window_bounds = array<i64: 32, 64>}, {pipeline_mode = #tpu.pipeline_mode<synchronous>, transform_indices = @transform_8, window_bounds = array<i64: 1, 64>}, {pipeline_mode = #tpu.pipeline_mode<synchronous>, transform_indices = @transform_9, window_bounds = array<i64: 64, 32>}, {pipeline_mode = #tpu.pipeline_mode<synchronous>, transform_indices = @transform_10, window_bounds = array<i64: 1, 32>}, {pipeline_mode = #tpu.pipeline_mode<synchronous>, transform_indices = @transform_11, window_bounds = array<i64: 1, 32>}, {pipeline_mode = #tpu.pipeline_mode<synchronous>, transform_indices = @transform_12, window_bounds = array<i64: 1, 32>}, {pipeline_mode = #tpu.pipeline_mode<synchronous>, transform_indices = @transform_13, window_bounds = array<i64: 1, 32>}, {pipeline_mode = #tpu.pipeline_mode<synchronous>, transform_indices = @transform_14, window_bounds = array<i64: 1, 32>}, {transform_indices = @transform_15, window_bounds = array<i64: 1, 8, 32>}]} {
    %c0_i32 = arith.constant 0 : i32
    %0 = arith.cmpi eq, %arg1, %c0_i32 : i32
    %1 = arith.extui %0 : i1 to i32
    %c0_i32_0 = arith.constant 0 : i32
    %2 = arith.cmpi ne, %1, %c0_i32_0 : i32
    scf.if %2 {
      %c0_110 = arith.constant 0 : index
      %c0_111 = arith.constant 0 : index
      %c0_112 = arith.constant 0 : index
      %193 = vector.load %arg2[%c0_110, %c0_111, %c0_112] : memref<1x8x32xf32, #tpu.memory_space<vmem>>, vector<1x8x32xf32>
      %194 = vector.shape_cast %193 : vector<1x8x32xf32> to vector<8x32xf32>
      %195 = arith.truncf %194 : vector<8x32xf32> to vector<8x32xbf16>
      %c0_113 = arith.constant 0 : index
      %c0_114 = arith.constant 0 : index
      %c0_115 = arith.constant 0 : index
      %196 = vector.load %arg6[%c0_113, %c0_114, %c0_115] : memref<4x32x8xbf16, #tpu.memory_space<vmem>>, vector<1x32x8xbf16>
      %197 = vector.shape_cast %196 : vector<1x32x8xbf16> to vector<32x8xbf16>
      %cst_116 = arith.constant dense<0.000000e+00> : vector<8x8xf32>
      %198 = tpu.matmul %195, %197, %cst_116 {dimension_numbers = #tpu.dot_dimension_numbers<[1], [0], [0], [1], [0, 0, 1, 1], [], []>} : vector<8x32xbf16>, vector<32x8xbf16>, vector<8x8xf32> -> vector<8x8xf32>
      %199 = arith.truncf %198 : vector<8x8xf32> to vector<8x8xbf16>
      %c0_117 = arith.constant 0 : index
      %c0_118 = arith.constant 0 : index
      %c0_119 = arith.constant 0 : index
      %200 = vector.load %arg18[%c0_117, %c0_118, %c0_119] : memref<4x8x8xbf16, #tpu.memory_space<vmem>>, vector<1x8x8xbf16>
      %201 = vector.shape_cast %200 : vector<1x8x8xbf16> to vector<8x8xbf16>
      %202 = vector.shape_cast %199 : vector<8x8xbf16> to vector<1x8x8xbf16>
      tpu.vector_store %arg18[%c0_117, %c0_118, %c0_119], %202 {strides = array<i32>} : memref<4x8x8xbf16, #tpu.memory_space<vmem>>, vector<1x8x8xbf16>,
      %c0_120 = arith.constant 0 : index
      %c0_121 = arith.constant 0 : index
      %c0_122 = arith.constant 0 : index
      %203 = vector.load %arg7[%c0_120, %c0_121, %c0_122] : memref<4x32x8xbf16, #tpu.memory_space<vmem>>, vector<1x32x8xbf16>
      %204 = vector.shape_cast %203 : vector<1x32x8xbf16> to vector<32x8xbf16>
      %cst_123 = arith.constant dense<0.000000e+00> : vector<8x8xf32>
      %205 = tpu.matmul %195, %204, %cst_123 {dimension_numbers = #tpu.dot_dimension_numbers<[1], [0], [0], [1], [0, 0, 1, 1], [], []>} : vector<8x32xbf16>, vector<32x8xbf16>, vector<8x8xf32> -> vector<8x8xf32>
      %206 = arith.truncf %205 : vector<8x8xf32> to vector<8x8xbf16>
      %c0_124 = arith.constant 0 : index
      %c0_125 = arith.constant 0 : index
      %c0_126 = arith.constant 0 : index
      %207 = vector.load %arg19[%c0_124, %c0_125, %c0_126] : memref<4x8x8xbf16, #tpu.memory_space<vmem>>, vector<1x8x8xbf16>
      %208 = vector.shape_cast %207 : vector<1x8x8xbf16> to vector<8x8xbf16>
      %209 = vector.shape_cast %206 : vector<8x8xbf16> to vector<1x8x8xbf16>
      tpu.vector_store %arg19[%c0_124, %c0_125, %c0_126], %209 {strides = array<i32>} : memref<4x8x8xbf16, #tpu.memory_space<vmem>>, vector<1x8x8xbf16>,
      %c1_127 = arith.constant 1 : index
      %c0_128 = arith.constant 0 : index
      %c0_129 = arith.constant 0 : index
      %210 = vector.load %arg6[%c1_127, %c0_128, %c0_129] : memref<4x32x8xbf16, #tpu.memory_space<vmem>>, vector<1x32x8xbf16>
      %211 = vector.shape_cast %210 : vector<1x32x8xbf16> to vector<32x8xbf16>
      %cst_130 = arith.constant dense<0.000000e+00> : vector<8x8xf32>
      %212 = tpu.matmul %195, %211, %cst_130 {dimension_numbers = #tpu.dot_dimension_numbers<[1], [0], [0], [1], [0, 0, 1, 1], [], []>} : vector<8x32xbf16>, vector<32x8xbf16>, vector<8x8xf32> -> vector<8x8xf32>
      %213 = arith.truncf %212 : vector<8x8xf32> to vector<8x8xbf16>
      %c1_131 = arith.constant 1 : index
      %c0_132 = arith.constant 0 : index
      %c0_133 = arith.constant 0 : index
      %214 = vector.load %arg18[%c1_131, %c0_132, %c0_133] : memref<4x8x8xbf16, #tpu.memory_space<vmem>>, vector<1x8x8xbf16>
      %215 = vector.shape_cast %214 : vector<1x8x8xbf16> to vector<8x8xbf16>
      %216 = vector.shape_cast %213 : vector<8x8xbf16> to vector<1x8x8xbf16>
      tpu.vector_store %arg18[%c1_131, %c0_132, %c0_133], %216 {strides = array<i32>} : memref<4x8x8xbf16, #tpu.memory_space<vmem>>, vector<1x8x8xbf16>,
      %c1_134 = arith.constant 1 : index
      %c0_135 = arith.constant 0 : index
      %c0_136 = arith.constant 0 : index
      %217 = vector.load %arg7[%c1_134, %c0_135, %c0_136] : memref<4x32x8xbf16, #tpu.memory_space<vmem>>, vector<1x32x8xbf16>
      %218 = vector.shape_cast %217 : vector<1x32x8xbf16> to vector<32x8xbf16>
      %cst_137 = arith.constant dense<0.000000e+00> : vector<8x8xf32>
      %219 = tpu.matmul %195, %218, %cst_137 {dimension_numbers = #tpu.dot_dimension_numbers<[1], [0], [0], [1], [0, 0, 1, 1], [], []>} : vector<8x32xbf16>, vector<32x8xbf16>, vector<8x8xf32> -> vector<8x8xf32>
      %220 = arith.truncf %219 : vector<8x8xf32> to vector<8x8xbf16>
      %c1_138 = arith.constant 1 : index
      %c0_139 = arith.constant 0 : index
      %c0_140 = arith.constant 0 : index
      %221 = vector.load %arg19[%c1_138, %c0_139, %c0_140] : memref<4x8x8xbf16, #tpu.memory_space<vmem>>, vector<1x8x8xbf16>
      %222 = vector.shape_cast %221 : vector<1x8x8xbf16> to vector<8x8xbf16>
      %223 = vector.shape_cast %220 : vector<8x8xbf16> to vector<1x8x8xbf16>
      tpu.vector_store %arg19[%c1_138, %c0_139, %c0_140], %223 {strides = array<i32>} : memref<4x8x8xbf16, #tpu.memory_space<vmem>>, vector<1x8x8xbf16>,
      %c2_141 = arith.constant 2 : index
      %c0_142 = arith.constant 0 : index
      %c0_143 = arith.constant 0 : index
      %224 = vector.load %arg6[%c2_141, %c0_142, %c0_143] : memref<4x32x8xbf16, #tpu.memory_space<vmem>>, vector<1x32x8xbf16>
      %225 = vector.shape_cast %224 : vector<1x32x8xbf16> to vector<32x8xbf16>
      %cst_144 = arith.constant dense<0.000000e+00> : vector<8x8xf32>
      %226 = tpu.matmul %195, %225, %cst_144 {dimension_numbers = #tpu.dot_dimension_numbers<[1], [0], [0], [1], [0, 0, 1, 1], [], []>} : vector<8x32xbf16>, vector<32x8xbf16>, vector<8x8xf32> -> vector<8x8xf32>
      %227 = arith.truncf %226 : vector<8x8xf32> to vector<8x8xbf16>
      %c2_145 = arith.constant 2 : index
      %c0_146 = arith.constant 0 : index
      %c0_147 = arith.constant 0 : index
      %228 = vector.load %arg18[%c2_145, %c0_146, %c0_147] : memref<4x8x8xbf16, #tpu.memory_space<vmem>>, vector<1x8x8xbf16>
      %229 = vector.shape_cast %228 : vector<1x8x8xbf16> to vector<8x8xbf16>
      %230 = vector.shape_cast %227 : vector<8x8xbf16> to vector<1x8x8xbf16>
      tpu.vector_store %arg18[%c2_145, %c0_146, %c0_147], %230 {strides = array<i32>} : memref<4x8x8xbf16, #tpu.memory_space<vmem>>, vector<1x8x8xbf16>,
      %c2_148 = arith.constant 2 : index
      %c0_149 = arith.constant 0 : index
      %c0_150 = arith.constant 0 : index
      %231 = vector.load %arg7[%c2_148, %c0_149, %c0_150] : memref<4x32x8xbf16, #tpu.memory_space<vmem>>, vector<1x32x8xbf16>
      %232 = vector.shape_cast %231 : vector<1x32x8xbf16> to vector<32x8xbf16>
      %cst_151 = arith.constant dense<0.000000e+00> : vector<8x8xf32>
      %233 = tpu.matmul %195, %232, %cst_151 {dimension_numbers = #tpu.dot_dimension_numbers<[1], [0], [0], [1], [0, 0, 1, 1], [], []>} : vector<8x32xbf16>, vector<32x8xbf16>, vector<8x8xf32> -> vector<8x8xf32>
      %234 = arith.truncf %233 : vector<8x8xf32> to vector<8x8xbf16>
      %c2_152 = arith.constant 2 : index
      %c0_153 = arith.constant 0 : index
      %c0_154 = arith.constant 0 : index
      %235 = vector.load %arg19[%c2_152, %c0_153, %c0_154] : memref<4x8x8xbf16, #tpu.memory_space<vmem>>, vector<1x8x8xbf16>
      %236 = vector.shape_cast %235 : vector<1x8x8xbf16> to vector<8x8xbf16>
      %237 = vector.shape_cast %234 : vector<8x8xbf16> to vector<1x8x8xbf16>
      tpu.vector_store %arg19[%c2_152, %c0_153, %c0_154], %237 {strides = array<i32>} : memref<4x8x8xbf16, #tpu.memory_space<vmem>>, vector<1x8x8xbf16>,
      %c3_155 = arith.constant 3 : index
      %c0_156 = arith.constant 0 : index
      %c0_157 = arith.constant 0 : index
      %238 = vector.load %arg6[%c3_155, %c0_156, %c0_157] : memref<4x32x8xbf16, #tpu.memory_space<vmem>>, vector<1x32x8xbf16>
      %239 = vector.shape_cast %238 : vector<1x32x8xbf16> to vector<32x8xbf16>
      %cst_158 = arith.constant dense<0.000000e+00> : vector<8x8xf32>
      %240 = tpu.matmul %195, %239, %cst_158 {dimension_numbers = #tpu.dot_dimension_numbers<[1], [0], [0], [1], [0, 0, 1, 1], [], []>} : vector<8x32xbf16>, vector<32x8xbf16>, vector<8x8xf32> -> vector<8x8xf32>
      %241 = arith.truncf %240 : vector<8x8xf32> to vector<8x8xbf16>
      %c3_159 = arith.constant 3 : index
      %c0_160 = arith.constant 0 : index
      %c0_161 = arith.constant 0 : index
      %242 = vector.load %arg18[%c3_159, %c0_160, %c0_161] : memref<4x8x8xbf16, #tpu.memory_space<vmem>>, vector<1x8x8xbf16>
      %243 = vector.shape_cast %242 : vector<1x8x8xbf16> to vector<8x8xbf16>
      %244 = vector.shape_cast %241 : vector<8x8xbf16> to vector<1x8x8xbf16>
      tpu.vector_store %arg18[%c3_159, %c0_160, %c0_161], %244 {strides = array<i32>} : memref<4x8x8xbf16, #tpu.memory_space<vmem>>, vector<1x8x8xbf16>,
      %c3_162 = arith.constant 3 : index
      %c0_163 = arith.constant 0 : index
      %c0_164 = arith.constant 0 : index
      %245 = vector.load %arg7[%c3_162, %c0_163, %c0_164] : memref<4x32x8xbf16, #tpu.memory_space<vmem>>, vector<1x32x8xbf16>
      %246 = vector.shape_cast %245 : vector<1x32x8xbf16> to vector<32x8xbf16>
      %cst_165 = arith.constant dense<0.000000e+00> : vector<8x8xf32>
      %247 = tpu.matmul %195, %246, %cst_165 {dimension_numbers = #tpu.dot_dimension_numbers<[1], [0], [0], [1], [0, 0, 1, 1], [], []>} : vector<8x32xbf16>, vector<32x8xbf16>, vector<8x8xf32> -> vector<8x8xf32>
      %248 = arith.truncf %247 : vector<8x8xf32> to vector<8x8xbf16>
      %c3_166 = arith.constant 3 : index
      %c0_167 = arith.constant 0 : index
      %c0_168 = arith.constant 0 : index
      %249 = vector.load %arg19[%c3_166, %c0_167, %c0_168] : memref<4x8x8xbf16, #tpu.memory_space<vmem>>, vector<1x8x8xbf16>
      %250 = vector.shape_cast %249 : vector<1x8x8xbf16> to vector<8x8xbf16>
      %251 = vector.shape_cast %248 : vector<8x8xbf16> to vector<1x8x8xbf16>
      tpu.vector_store %arg19[%c3_166, %c0_167, %c0_168], %251 {strides = array<i32>} : memref<4x8x8xbf16, #tpu.memory_space<vmem>>, vector<1x8x8xbf16>,
    } else {
    }
    %c0 = arith.constant 0 : index
    %c0_1 = arith.constant 0 : index
    %c0_2 = arith.constant 0 : index
    %3 = vector.load %arg3[%c0, %c0_1, %c0_2] : memref<1x8x32xf32, #tpu.memory_space<vmem>>, vector<1x8x32xf32>
    %4 = vector.shape_cast %3 : vector<1x8x32xf32> to vector<8x32xf32>
    %5 = arith.truncf %4 : vector<8x32xf32> to vector<8x32xbf16>
    %c0_3 = arith.constant 0 : index
    %c0_4 = arith.constant 0 : index
    %c0_5 = arith.constant 0 : index
    %6 = vector.load %arg4[%c0_3, %c0_4, %c0_5] : memref<1x1x8xf32, #tpu.memory_space<vmem>>, vector<1x1x8xf32>
    %7 = vector.shape_cast %6 : vector<1x1x8xf32> to vector<1x8xf32>
    %cst = arith.constant 0.000000e+00 : f32
    %8 = vector.broadcast %cst : f32 to vector<1x8xf32>
    %9 = arith.cmpf oeq, %7, %8 : vector<1x8xf32>
    %cst_6 = arith.constant -1.000000e+09 : f32
    %cst_7 = arith.constant 0.000000e+00 : f32
    %10 = vector.broadcast %cst_6 : f32 to vector<1x8xf32>
    %11 = vector.broadcast %cst_7 : f32 to vector<1x8xf32>
    %12 = arith.select %9, %10, %11 : vector<1x8xi1>, vector<1x8xf32>
    %cst_8 = arith.constant 0.000000e+00 : f32
    %13 = vector.broadcast %cst_8 : f32 to vector<8x32xf32>
    %c0_9 = arith.constant 0 : index
    %c0_10 = arith.constant 0 : index
    %c0_11 = arith.constant 0 : index
    %14 = vector.load %arg5[%c0_9, %c0_10, %c0_11] : memref<4x32x8xbf16, #tpu.memory_space<vmem>>, vector<1x32x8xbf16>
    %15 = vector.shape_cast %14 : vector<1x32x8xbf16> to vector<32x8xbf16>
    %cst_12 = arith.constant dense<0.000000e+00> : vector<8x8xf32>
    %16 = tpu.matmul %5, %15, %cst_12 {dimension_numbers = #tpu.dot_dimension_numbers<[1], [0], [0], [1], [0, 0, 1, 1], [], []>} : vector<8x32xbf16>, vector<32x8xbf16>, vector<8x8xf32> -> vector<8x8xf32>
    %c0_13 = arith.constant 0 : index
    %c0_14 = arith.constant 0 : index
    %c0_15 = arith.constant 0 : index
    %17 = vector.load %arg18[%c0_13, %c0_14, %c0_15] : memref<4x8x8xbf16, #tpu.memory_space<vmem>>, vector<1x8x8xbf16>
    %18 = vector.shape_cast %17 : vector<1x8x8xbf16> to vector<8x8xbf16>
    %c0_16 = arith.constant 0 : index
    %c0_17 = arith.constant 0 : index
    %c0_18 = arith.constant 0 : index
    %19 = vector.load %arg19[%c0_16, %c0_17, %c0_18] : memref<4x8x8xbf16, #tpu.memory_space<vmem>>, vector<1x8x8xbf16>
    %20 = vector.shape_cast %19 : vector<1x8x8xbf16> to vector<8x8xbf16>
    %21 = arith.truncf %16 : vector<8x8xf32> to vector<8x8xbf16>
    %cst_19 = arith.constant dense<0.000000e+00> : vector<8x8xf32>
    %22 = tpu.matmul %21, %18, %cst_19 {dimension_numbers = #tpu.dot_dimension_numbers<[1], [1], [0], [0], [0, 0, 1, 0], [], []>} : vector<8x8xbf16>, vector<8x8xbf16>, vector<8x8xf32> -> vector<8x8xf32>
    %23 = vector.broadcast %12 : vector<1x8xf32> to vector<8x8xf32>
    %24 = arith.addf %22, %23 : vector<8x8xf32>
    %cst_20 = arith.constant dense<0xFF800000> : vector<8xf32>
    %25 = vector.multi_reduction <maximumf>, %24, %cst_20 [1] : vector<8x8xf32> to vector<8xf32>
    %26 = vector.shape_cast %25 : vector<8xf32> to vector<8x1xf32>
    %27 = vector.broadcast %26 : vector<8x1xf32> to vector<8x8xf32>
    %28 = arith.subf %24, %27 : vector<8x8xf32>
    %29 = math.exp %28 : vector<8x8xf32>
    %cst_21 = arith.constant dense<0.000000e+00> : vector<8xf32>
    %30 = vector.multi_reduction <add>, %29, %cst_21 [1] : vector<8x8xf32> to vector<8xf32>
    %31 = vector.shape_cast %30 : vector<8xf32> to vector<8x1xf32>
    %32 = tpu.reciprocal %31 {approx = true} : vector<8x1xf32> -> vector<8x1xf32>
    %33 = vector.broadcast %32 : vector<8x1xf32> to vector<8x8xf32>
    %34 = arith.mulf %29, %33 : vector<8x8xf32>
    %35 = arith.truncf %34 : vector<8x8xf32> to vector<8x8xbf16>
    %cst_22 = arith.constant dense<0.000000e+00> : vector<8x8xf32>
    %36 = tpu.matmul %35, %20, %cst_22 {dimension_numbers = #tpu.dot_dimension_numbers<[1], [0], [0], [1], [0, 0, 1, 1], [], []>} : vector<8x8xbf16>, vector<8x8xbf16>, vector<8x8xf32> -> vector<8x8xf32>
    %37 = arith.truncf %36 : vector<8x8xf32> to vector<8x8xbf16>
    %c0_23 = arith.constant 0 : index
    %c0_24 = arith.constant 0 : index
    %c0_25 = arith.constant 0 : index
    %38 = vector.load %arg8[%c0_23, %c0_24, %c0_25] : memref<4x8x32xbf16, #tpu.memory_space<vmem>>, vector<1x8x32xbf16>
    %39 = vector.shape_cast %38 : vector<1x8x32xbf16> to vector<8x32xbf16>
    %cst_26 = arith.constant dense<0.000000e+00> : vector<8x32xf32>
    %40 = tpu.matmul %37, %39, %cst_26 {dimension_numbers = #tpu.dot_dimension_numbers<[1], [0], [0], [1], [0, 0, 1, 1], [], []>} : vector<8x8xbf16>, vector<8x32xbf16>, vector<8x32xf32> -> vector<8x32xf32>
    %41 = arith.addf %13, %40 : vector<8x32xf32>
    %c1 = arith.constant 1 : index
    %c0_27 = arith.constant 0 : index
    %c0_28 = arith.constant 0 : index
    %42 = vector.load %arg5[%c1, %c0_27, %c0_28] : memref<4x32x8xbf16, #tpu.memory_space<vmem>>, vector<1x32x8xbf16>
    %43 = vector.shape_cast %42 : vector<1x32x8xbf16> to vector<32x8xbf16>
    %cst_29 = arith.constant dense<0.000000e+00> : vector<8x8xf32>
    %44 = tpu.matmul %5, %43, %cst_29 {dimension_numbers = #tpu.dot_dimension_numbers<[1], [0], [0], [1], [0, 0, 1, 1], [], []>} : vector<8x32xbf16>, vector<32x8xbf16>, vector<8x8xf32> -> vector<8x8xf32>
    %c1_30 = arith.constant 1 : index
    %c0_31 = arith.constant 0 : index
    %c0_32 = arith.constant 0 : index
    %45 = vector.load %arg18[%c1_30, %c0_31, %c0_32] : memref<4x8x8xbf16, #tpu.memory_space<vmem>>, vector<1x8x8xbf16>
    %46 = vector.shape_cast %45 : vector<1x8x8xbf16> to vector<8x8xbf16>
    %c1_33 = arith.constant 1 : index
    %c0_34 = arith.constant 0 : index
    %c0_35 = arith.constant 0 : index
    %47 = vector.load %arg19[%c1_33, %c0_34, %c0_35] : memref<4x8x8xbf16, #tpu.memory_space<vmem>>, vector<1x8x8xbf16>
    %48 = vector.shape_cast %47 : vector<1x8x8xbf16> to vector<8x8xbf16>
    %49 = arith.truncf %44 : vector<8x8xf32> to vector<8x8xbf16>
    %cst_36 = arith.constant dense<0.000000e+00> : vector<8x8xf32>
    %50 = tpu.matmul %49, %46, %cst_36 {dimension_numbers = #tpu.dot_dimension_numbers<[1], [1], [0], [0], [0, 0, 1, 0], [], []>} : vector<8x8xbf16>, vector<8x8xbf16>, vector<8x8xf32> -> vector<8x8xf32>
    %51 = vector.broadcast %12 : vector<1x8xf32> to vector<8x8xf32>
    %52 = arith.addf %50, %51 : vector<8x8xf32>
    %cst_37 = arith.constant dense<0xFF800000> : vector<8xf32>
    %53 = vector.multi_reduction <maximumf>, %52, %cst_37 [1] : vector<8x8xf32> to vector<8xf32>
    %54 = vector.shape_cast %53 : vector<8xf32> to vector<8x1xf32>
    %55 = vector.broadcast %54 : vector<8x1xf32> to vector<8x8xf32>
    %56 = arith.subf %52, %55 : vector<8x8xf32>
    %57 = math.exp %56 : vector<8x8xf32>
    %cst_38 = arith.constant dense<0.000000e+00> : vector<8xf32>
    %58 = vector.multi_reduction <add>, %57, %cst_38 [1] : vector<8x8xf32> to vector<8xf32>
    %59 = vector.shape_cast %58 : vector<8xf32> to vector<8x1xf32>
    %60 = tpu.reciprocal %59 {approx = true} : vector<8x1xf32> -> vector<8x1xf32>
    %61 = vector.broadcast %60 : vector<8x1xf32> to vector<8x8xf32>
    %62 = arith.mulf %57, %61 : vector<8x8xf32>
    %63 = arith.truncf %62 : vector<8x8xf32> to vector<8x8xbf16>
    %cst_39 = arith.constant dense<0.000000e+00> : vector<8x8xf32>
    %64 = tpu.matmul %63, %48, %cst_39 {dimension_numbers = #tpu.dot_dimension_numbers<[1], [0], [0], [1], [0, 0, 1, 1], [], []>} : vector<8x8xbf16>, vector<8x8xbf16>, vector<8x8xf32> -> vector<8x8xf32>
    %65 = arith.truncf %64 : vector<8x8xf32> to vector<8x8xbf16>
    %c1_40 = arith.constant 1 : index
    %c0_41 = arith.constant 0 : index
    %c0_42 = arith.constant 0 : index
    %66 = vector.load %arg8[%c1_40, %c0_41, %c0_42] : memref<4x8x32xbf16, #tpu.memory_space<vmem>>, vector<1x8x32xbf16>
    %67 = vector.shape_cast %66 : vector<1x8x32xbf16> to vector<8x32xbf16>
    %cst_43 = arith.constant dense<0.000000e+00> : vector<8x32xf32>
    %68 = tpu.matmul %65, %67, %cst_43 {dimension_numbers = #tpu.dot_dimension_numbers<[1], [0], [0], [1], [0, 0, 1, 1], [], []>} : vector<8x8xbf16>, vector<8x32xbf16>, vector<8x32xf32> -> vector<8x32xf32>
    %69 = arith.addf %41, %68 : vector<8x32xf32>
    %c2 = arith.constant 2 : index
    %c0_44 = arith.constant 0 : index
    %c0_45 = arith.constant 0 : index
    %70 = vector.load %arg5[%c2, %c0_44, %c0_45] : memref<4x32x8xbf16, #tpu.memory_space<vmem>>, vector<1x32x8xbf16>
    %71 = vector.shape_cast %70 : vector<1x32x8xbf16> to vector<32x8xbf16>
    %cst_46 = arith.constant dense<0.000000e+00> : vector<8x8xf32>
    %72 = tpu.matmul %5, %71, %cst_46 {dimension_numbers = #tpu.dot_dimension_numbers<[1], [0], [0], [1], [0, 0, 1, 1], [], []>} : vector<8x32xbf16>, vector<32x8xbf16>, vector<8x8xf32> -> vector<8x8xf32>
    %c2_47 = arith.constant 2 : index
    %c0_48 = arith.constant 0 : index
    %c0_49 = arith.constant 0 : index
    %73 = vector.load %arg18[%c2_47, %c0_48, %c0_49] : memref<4x8x8xbf16, #tpu.memory_space<vmem>>, vector<1x8x8xbf16>
    %74 = vector.shape_cast %73 : vector<1x8x8xbf16> to vector<8x8xbf16>
    %c2_50 = arith.constant 2 : index
    %c0_51 = arith.constant 0 : index
    %c0_52 = arith.constant 0 : index
    %75 = vector.load %arg19[%c2_50, %c0_51, %c0_52] : memref<4x8x8xbf16, #tpu.memory_space<vmem>>, vector<1x8x8xbf16>
    %76 = vector.shape_cast %75 : vector<1x8x8xbf16> to vector<8x8xbf16>
    %77 = arith.truncf %72 : vector<8x8xf32> to vector<8x8xbf16>
    %cst_53 = arith.constant dense<0.000000e+00> : vector<8x8xf32>
    %78 = tpu.matmul %77, %74, %cst_53 {dimension_numbers = #tpu.dot_dimension_numbers<[1], [1], [0], [0], [0, 0, 1, 0], [], []>} : vector<8x8xbf16>, vector<8x8xbf16>, vector<8x8xf32> -> vector<8x8xf32>
    %79 = vector.broadcast %12 : vector<1x8xf32> to vector<8x8xf32>
    %80 = arith.addf %78, %79 : vector<8x8xf32>
    %cst_54 = arith.constant dense<0xFF800000> : vector<8xf32>
    %81 = vector.multi_reduction <maximumf>, %80, %cst_54 [1] : vector<8x8xf32> to vector<8xf32>
    %82 = vector.shape_cast %81 : vector<8xf32> to vector<8x1xf32>
    %83 = vector.broadcast %82 : vector<8x1xf32> to vector<8x8xf32>
    %84 = arith.subf %80, %83 : vector<8x8xf32>
    %85 = math.exp %84 : vector<8x8xf32>
    %cst_55 = arith.constant dense<0.000000e+00> : vector<8xf32>
    %86 = vector.multi_reduction <add>, %85, %cst_55 [1] : vector<8x8xf32> to vector<8xf32>
    %87 = vector.shape_cast %86 : vector<8xf32> to vector<8x1xf32>
    %88 = tpu.reciprocal %87 {approx = true} : vector<8x1xf32> -> vector<8x1xf32>
    %89 = vector.broadcast %88 : vector<8x1xf32> to vector<8x8xf32>
    %90 = arith.mulf %85, %89 : vector<8x8xf32>
    %91 = arith.truncf %90 : vector<8x8xf32> to vector<8x8xbf16>
    %cst_56 = arith.constant dense<0.000000e+00> : vector<8x8xf32>
    %92 = tpu.matmul %91, %76, %cst_56 {dimension_numbers = #tpu.dot_dimension_numbers<[1], [0], [0], [1], [0, 0, 1, 1], [], []>} : vector<8x8xbf16>, vector<8x8xbf16>, vector<8x8xf32> -> vector<8x8xf32>
    %93 = arith.truncf %92 : vector<8x8xf32> to vector<8x8xbf16>
    %c2_57 = arith.constant 2 : index
    %c0_58 = arith.constant 0 : index
    %c0_59 = arith.constant 0 : index
    %94 = vector.load %arg8[%c2_57, %c0_58, %c0_59] : memref<4x8x32xbf16, #tpu.memory_space<vmem>>, vector<1x8x32xbf16>
    %95 = vector.shape_cast %94 : vector<1x8x32xbf16> to vector<8x32xbf16>
    %cst_60 = arith.constant dense<0.000000e+00> : vector<8x32xf32>
    %96 = tpu.matmul %93, %95, %cst_60 {dimension_numbers = #tpu.dot_dimension_numbers<[1], [0], [0], [1], [0, 0, 1, 1], [], []>} : vector<8x8xbf16>, vector<8x32xbf16>, vector<8x32xf32> -> vector<8x32xf32>
    %97 = arith.addf %69, %96 : vector<8x32xf32>
    %c3 = arith.constant 3 : index
    %c0_61 = arith.constant 0 : index
    %c0_62 = arith.constant 0 : index
    %98 = vector.load %arg5[%c3, %c0_61, %c0_62] : memref<4x32x8xbf16, #tpu.memory_space<vmem>>, vector<1x32x8xbf16>
    %99 = vector.shape_cast %98 : vector<1x32x8xbf16> to vector<32x8xbf16>
    %cst_63 = arith.constant dense<0.000000e+00> : vector<8x8xf32>
    %100 = tpu.matmul %5, %99, %cst_63 {dimension_numbers = #tpu.dot_dimension_numbers<[1], [0], [0], [1], [0, 0, 1, 1], [], []>} : vector<8x32xbf16>, vector<32x8xbf16>, vector<8x8xf32> -> vector<8x8xf32>
    %c3_64 = arith.constant 3 : index
    %c0_65 = arith.constant 0 : index
    %c0_66 = arith.constant 0 : index
    %101 = vector.load %arg18[%c3_64, %c0_65, %c0_66] : memref<4x8x8xbf16, #tpu.memory_space<vmem>>, vector<1x8x8xbf16>
    %102 = vector.shape_cast %101 : vector<1x8x8xbf16> to vector<8x8xbf16>
    %c3_67 = arith.constant 3 : index
    %c0_68 = arith.constant 0 : index
    %c0_69 = arith.constant 0 : index
    %103 = vector.load %arg19[%c3_67, %c0_68, %c0_69] : memref<4x8x8xbf16, #tpu.memory_space<vmem>>, vector<1x8x8xbf16>
    %104 = vector.shape_cast %103 : vector<1x8x8xbf16> to vector<8x8xbf16>
    %105 = arith.truncf %100 : vector<8x8xf32> to vector<8x8xbf16>
    %cst_70 = arith.constant dense<0.000000e+00> : vector<8x8xf32>
    %106 = tpu.matmul %105, %102, %cst_70 {dimension_numbers = #tpu.dot_dimension_numbers<[1], [1], [0], [0], [0, 0, 1, 0], [], []>} : vector<8x8xbf16>, vector<8x8xbf16>, vector<8x8xf32> -> vector<8x8xf32>
    %107 = vector.broadcast %12 : vector<1x8xf32> to vector<8x8xf32>
    %108 = arith.addf %106, %107 : vector<8x8xf32>
    %cst_71 = arith.constant dense<0xFF800000> : vector<8xf32>
    %109 = vector.multi_reduction <maximumf>, %108, %cst_71 [1] : vector<8x8xf32> to vector<8xf32>
    %110 = vector.shape_cast %109 : vector<8xf32> to vector<8x1xf32>
    %111 = vector.broadcast %110 : vector<8x1xf32> to vector<8x8xf32>
    %112 = arith.subf %108, %111 : vector<8x8xf32>
    %113 = math.exp %112 : vector<8x8xf32>
    %cst_72 = arith.constant dense<0.000000e+00> : vector<8xf32>
    %114 = vector.multi_reduction <add>, %113, %cst_72 [1] : vector<8x8xf32> to vector<8xf32>
    %115 = vector.shape_cast %114 : vector<8xf32> to vector<8x1xf32>
    %116 = tpu.reciprocal %115 {approx = true} : vector<8x1xf32> -> vector<8x1xf32>
    %117 = vector.broadcast %116 : vector<8x1xf32> to vector<8x8xf32>
    %118 = arith.mulf %113, %117 : vector<8x8xf32>
    %119 = arith.truncf %118 : vector<8x8xf32> to vector<8x8xbf16>
    %cst_73 = arith.constant dense<0.000000e+00> : vector<8x8xf32>
    %120 = tpu.matmul %119, %104, %cst_73 {dimension_numbers = #tpu.dot_dimension_numbers<[1], [0], [0], [1], [0, 0, 1, 1], [], []>} : vector<8x8xbf16>, vector<8x8xbf16>, vector<8x8xf32> -> vector<8x8xf32>
    %121 = arith.truncf %120 : vector<8x8xf32> to vector<8x8xbf16>
    %c3_74 = arith.constant 3 : index
    %c0_75 = arith.constant 0 : index
    %c0_76 = arith.constant 0 : index
    %122 = vector.load %arg8[%c3_74, %c0_75, %c0_76] : memref<4x8x32xbf16, #tpu.memory_space<vmem>>, vector<1x8x32xbf16>
    %123 = vector.shape_cast %122 : vector<1x8x32xbf16> to vector<8x32xbf16>
    %cst_77 = arith.constant dense<0.000000e+00> : vector<8x32xf32>
    %124 = tpu.matmul %121, %123, %cst_77 {dimension_numbers = #tpu.dot_dimension_numbers<[1], [0], [0], [1], [0, 0, 1, 1], [], []>} : vector<8x8xbf16>, vector<8x32xbf16>, vector<8x32xf32> -> vector<8x32xf32>
    %125 = arith.addf %97, %124 : vector<8x32xf32>
    %126 = arith.addf %4, %125 : vector<8x32xf32>
    %cst_78 = arith.constant dense<0.000000e+00> : vector<8xf32>
    %127 = vector.multi_reduction <add>, %126, %cst_78 [1] : vector<8x32xf32> to vector<8xf32>
    %128 = vector.shape_cast %127 : vector<8xf32> to vector<8x1xf32>
    %cst_79 = arith.constant 3.200000e+01 : f32
    %129 = vector.broadcast %cst_79 : f32 to vector<8x1xf32>
    %130 = arith.divf %128, %129 : vector<8x1xf32>
    %131 = vector.broadcast %130 : vector<8x1xf32> to vector<8x32xf32>
    %132 = arith.subf %126, %131 : vector<8x32xf32>
    %133 = arith.mulf %132, %132 : vector<8x32xf32>
    %cst_80 = arith.constant dense<0.000000e+00> : vector<8xf32>
    %134 = vector.multi_reduction <add>, %133, %cst_80 [1] : vector<8x32xf32> to vector<8xf32>
    %135 = vector.shape_cast %134 : vector<8xf32> to vector<8x1xf32>
    %cst_81 = arith.constant 3.200000e+01 : f32
    %136 = vector.broadcast %cst_81 : f32 to vector<8x1xf32>
    %137 = arith.divf %135, %136 : vector<8x1xf32>
    %138 = vector.broadcast %130 : vector<8x1xf32> to vector<8x32xf32>
    %139 = arith.subf %126, %138 : vector<8x32xf32>
    %cst_82 = arith.constant 9.99999974E-6 : f32
    %140 = vector.broadcast %cst_82 : f32 to vector<8x1xf32>
    %141 = arith.addf %137, %140 : vector<8x1xf32>
    %142 = math.rsqrt %141 : vector<8x1xf32>
    %143 = vector.broadcast %142 : vector<8x1xf32> to vector<8x32xf32>
    %144 = arith.mulf %139, %143 : vector<8x32xf32>
    %c0_83 = arith.constant 0 : index
    %c0_84 = arith.constant 0 : index
    %145 = vector.load %arg13[%c0_83, %c0_84] : memref<1x32xf32, #tpu.memory_space<vmem>>, vector<1x32xf32>
    %146 = vector.broadcast %145 : vector<1x32xf32> to vector<8x32xf32>
    %147 = arith.mulf %144, %146 : vector<8x32xf32>
    %c0_85 = arith.constant 0 : index
    %c0_86 = arith.constant 0 : index
    %148 = vector.load %arg14[%c0_85, %c0_86] : memref<1x32xf32, #tpu.memory_space<vmem>>, vector<1x32xf32>
    %149 = vector.broadcast %148 : vector<1x32xf32> to vector<8x32xf32>
    %150 = arith.addf %147, %149 : vector<8x32xf32>
    %151 = arith.truncf %150 : vector<8x32xf32> to vector<8x32xbf16>
    %c0_87 = arith.constant 0 : index
    %c0_88 = arith.constant 0 : index
    %152 = vector.load %arg9[%c0_87, %c0_88] : memref<32x64xbf16, #tpu.memory_space<vmem>>, vector<32x64xbf16>
    %cst_89 = arith.constant dense<0.000000e+00> : vector<8x64xf32>
    %153 = tpu.matmul %151, %152, %cst_89 {dimension_numbers = #tpu.dot_dimension_numbers<[1], [0], [0], [1], [0, 0, 1, 1], [], []>} : vector<8x32xbf16>, vector<32x64xbf16>, vector<8x64xf32> -> vector<8x64xf32>
    %c0_90 = arith.constant 0 : index
    %c0_91 = arith.constant 0 : index
    %154 = vector.load %arg10[%c0_90, %c0_91] : memref<1x64xf32, #tpu.memory_space<vmem>>, vector<1x64xf32>
    %155 = vector.broadcast %154 : vector<1x64xf32> to vector<8x64xf32>
    %156 = arith.addf %153, %155 : vector<8x64xf32>
    %cst_92 = arith.constant 0.000000e+00 : f32
    %157 = vector.broadcast %cst_92 : f32 to vector<8x64xf32>
    %158 = arith.maximumf %156, %157 : vector<8x64xf32>
    %159 = arith.truncf %158 : vector<8x64xf32> to vector<8x64xbf16>
    %c0_93 = arith.constant 0 : index
    %c0_94 = arith.constant 0 : index
    %160 = vector.load %arg11[%c0_93, %c0_94] : memref<64x32xbf16, #tpu.memory_space<vmem>>, vector<64x32xbf16>
    %cst_95 = arith.constant dense<0.000000e+00> : vector<8x32xf32>
    %161 = tpu.matmul %159, %160, %cst_95 {dimension_numbers = #tpu.dot_dimension_numbers<[1], [0], [0], [1], [0, 0, 1, 1], [], []>} : vector<8x64xbf16>, vector<64x32xbf16>, vector<8x32xf32> -> vector<8x32xf32>
    %c0_96 = arith.constant 0 : index
    %c0_97 = arith.constant 0 : index
    %162 = vector.load %arg12[%c0_96, %c0_97] : memref<1x32xf32, #tpu.memory_space<vmem>>, vector<1x32xf32>
    %163 = vector.broadcast %162 : vector<1x32xf32> to vector<8x32xf32>
    %164 = arith.addf %161, %163 : vector<8x32xf32>
    %165 = arith.addf %150, %164 : vector<8x32xf32>
    %cst_98 = arith.constant dense<0.000000e+00> : vector<8xf32>
    %166 = vector.multi_reduction <add>, %165, %cst_98 [1] : vector<8x32xf32> to vector<8xf32>
    %167 = vector.shape_cast %166 : vector<8xf32> to vector<8x1xf32>
    %cst_99 = arith.constant 3.200000e+01 : f32
    %168 = vector.broadcast %cst_99 : f32 to vector<8x1xf32>
    %169 = arith.divf %167, %168 : vector<8x1xf32>
    %170 = vector.broadcast %169 : vector<8x1xf32> to vector<8x32xf32>
    %171 = arith.subf %165, %170 : vector<8x32xf32>
    %172 = arith.mulf %171, %171 : vector<8x32xf32>
    %cst_100 = arith.constant dense<0.000000e+00> : vector<8xf32>
    %173 = vector.multi_reduction <add>, %172, %cst_100 [1] : vector<8x32xf32> to vector<8xf32>
    %174 = vector.shape_cast %173 : vector<8xf32> to vector<8x1xf32>
    %cst_101 = arith.constant 3.200000e+01 : f32
    %175 = vector.broadcast %cst_101 : f32 to vector<8x1xf32>
    %176 = arith.divf %174, %175 : vector<8x1xf32>
    %177 = vector.broadcast %169 : vector<8x1xf32> to vector<8x32xf32>
    %178 = arith.subf %165, %177 : vector<8x32xf32>
    %cst_102 = arith.constant 9.99999974E-6 : f32
    %179 = vector.broadcast %cst_102 : f32 to vector<8x1xf32>
    %180 = arith.addf %176, %179 : vector<8x1xf32>
    %181 = math.rsqrt %180 : vector<8x1xf32>
    %182 = vector.broadcast %181 : vector<8x1xf32> to vector<8x32xf32>
    %183 = arith.mulf %178, %182 : vector<8x32xf32>
    %c0_103 = arith.constant 0 : index
    %c0_104 = arith.constant 0 : index
    %184 = vector.load %arg15[%c0_103, %c0_104] : memref<1x32xf32, #tpu.memory_space<vmem>>, vector<1x32xf32>
    %185 = vector.broadcast %184 : vector<1x32xf32> to vector<8x32xf32>
    %186 = arith.mulf %183, %185 : vector<8x32xf32>
    %c0_105 = arith.constant 0 : index
    %c0_106 = arith.constant 0 : index
    %187 = vector.load %arg16[%c0_105, %c0_106] : memref<1x32xf32, #tpu.memory_space<vmem>>, vector<1x32xf32>
    %188 = vector.broadcast %187 : vector<1x32xf32> to vector<8x32xf32>
    %189 = arith.addf %186, %188 : vector<8x32xf32>
    %c0_107 = arith.constant 0 : index
    %c0_108 = arith.constant 0 : index
    %c0_109 = arith.constant 0 : index
    %190 = vector.load %arg17[%c0_107, %c0_108, %c0_109] : memref<1x8x32xf32, #tpu.memory_space<vmem>>, vector<1x8x32xf32>
    %191 = vector.shape_cast %190 : vector<1x8x32xf32> to vector<8x32xf32>
    %192 = vector.shape_cast %189 : vector<8x32xf32> to vector<1x8x32xf32>
    tpu.vector_store %arg17[%c0_107, %c0_108, %c0_109], %192 {strides = array<i32>} : memref<1x8x32xf32, #tpu.memory_space<vmem>>, vector<1x8x32xf32>,
    return
  }
  func.func @transform_0(%arg0: i32, %arg1: i32) -> (i32, i32, i32) {
    %c0_i32 = arith.constant 0 : i32
    %c0_i32_0 = arith.constant 0 : i32
    %c0_i32_1 = arith.constant 0 : i32
    return %arg0, %c0_i32, %c0_i32_0 : i32, i32, i32
  }
  func.func @transform_1(%arg0: i32, %arg1: i32) -> (i32, i32, i32) {
    %c0_i32 = arith.constant 0 : i32
    %c0_i32_0 = arith.constant 0 : i32
    return %arg0, %arg1, %c0_i32 : i32, i32, i32
  }
  func.func @transform_2(%arg0: i32, %arg1: i32) -> (i32, i32, i32) {
    %c0_i32 = arith.constant 0 : i32
    %c0_i32_0 = arith.constant 0 : i32
    %c0_i32_1 = arith.constant 0 : i32
    return %arg0, %c0_i32, %c0_i32_0 : i32, i32, i32
  }
  func.func @transform_3(%arg0: i32, %arg1: i32) -> (i32, i32, i32) {
    %c0_i32 = arith.constant 0 : i32
    %c0_i32_0 = arith.constant 0 : i32
    %c0_i32_1 = arith.constant 0 : i32
    %c0_i32_2 = arith.constant 0 : i32
    return %c0_i32, %c0_i32_0, %c0_i32_1 : i32, i32, i32
  }
  func.func @transform_4(%arg0: i32, %arg1: i32) -> (i32, i32, i32) {
    %c0_i32 = arith.constant 0 : i32
    %c0_i32_0 = arith.constant 0 : i32
    %c0_i32_1 = arith.constant 0 : i32
    %c0_i32_2 = arith.constant 0 : i32
    return %c0_i32, %c0_i32_0, %c0_i32_1 : i32, i32, i32
  }
  func.func @transform_5(%arg0: i32, %arg1: i32) -> (i32, i32, i32) {
    %c0_i32 = arith.constant 0 : i32
    %c0_i32_0 = arith.constant 0 : i32
    %c0_i32_1 = arith.constant 0 : i32
    %c0_i32_2 = arith.constant 0 : i32
    return %c0_i32, %c0_i32_0, %c0_i32_1 : i32, i32, i32
  }
  func.func @transform_6(%arg0: i32, %arg1: i32) -> (i32, i32, i32) {
    %c0_i32 = arith.constant 0 : i32
    %c0_i32_0 = arith.constant 0 : i32
    %c0_i32_1 = arith.constant 0 : i32
    %c0_i32_2 = arith.constant 0 : i32
    return %c0_i32, %c0_i32_0, %c0_i32_1 : i32, i32, i32
  }
  func.func @transform_7(%arg0: i32, %arg1: i32) -> (i32, i32) {
    %c0_i32 = arith.constant 0 : i32
    %c0_i32_0 = arith.constant 0 : i32
    %c0_i32_1 = arith.constant 0 : i32
    return %c0_i32, %c0_i32_0 : i32, i32
  }
  func.func @transform_8(%arg0: i32, %arg1: i32) -> (i32, i32) {
    %c0_i32 = arith.constant 0 : i32
    %c0_i32_0 = arith.constant 0 : i32
    %c0_i32_1 = arith.constant 0 : i32
    return %c0_i32, %c0_i32_0 : i32, i32
  }
  func.func @transform_9(%arg0: i32, %arg1: i32) -> (i32, i32) {
    %c0_i32 = arith.constant 0 : i32
    %c0_i32_0 = arith.constant 0 : i32
    %c0_i32_1 = arith.constant 0 : i32
    return %c0_i32, %c0_i32_0 : i32, i32
  }
  func.func @transform_10(%arg0: i32, %arg1: i32) -> (i32, i32) {
    %c0_i32 = arith.constant 0 : i32
    %c0_i32_0 = arith.constant 0 : i32
    %c0_i32_1 = arith.constant 0 : i32
    return %c0_i32, %c0_i32_0 : i32, i32
  }
  func.func @transform_11(%arg0: i32, %arg1: i32) -> (i32, i32) {
    %c0_i32 = arith.constant 0 : i32
    %c0_i32_0 = arith.constant 0 : i32
    %c0_i32_1 = arith.constant 0 : i32
    return %c0_i32, %c0_i32_0 : i32, i32
  }
  func.func @transform_12(%arg0: i32, %arg1: i32) -> (i32, i32) {
    %c0_i32 = arith.constant 0 : i32
    %c0_i32_0 = arith.constant 0 : i32
    %c0_i32_1 = arith.constant 0 : i32
    return %c0_i32, %c0_i32_0 : i32, i32
  }
  func.func @transform_13(%arg0: i32, %arg1: i32) -> (i32, i32) {
    %c0_i32 = arith.constant 0 : i32
    %c0_i32_0 = arith.constant 0 : i32
    %c0_i32_1 = arith.constant 0 : i32
    return %c0_i32, %c0_i32_0 : i32, i32
  }
  func.func @transform_14(%arg0: i32, %arg1: i32) -> (i32, i32) {
    %c0_i32 = arith.constant 0 : i32
    %c0_i32_0 = arith.constant 0 : i32
    %c0_i32_1 = arith.constant 0 : i32
    return %c0_i32, %c0_i32_0 : i32, i32
  }
  func.func @transform_15(%arg0: i32, %arg1: i32) -> (i32, i32, i32) {
    %c0_i32 = arith.constant 0 : i32
    %c0_i32_0 = arith.constant 0 : i32
    return %arg0, %arg1, %c0_i32 : i32, i32, i32
  }
}

</mosaic_0001>

<bundles_post_ra>
// kernel: tpu_custom_call.1
= control target key start
LH: loop header
LB: loop body
LE: loop exit
PB: predicated region body
PF: predicated region fallthrough
CT: control target
= control target key end

     0   :  { %s3286_s0 = inlined_call_operand.vmem [shape: f32[2,8,32], index: 0, kind: input, shape index: {}]   ;;  %s3287_s1 = inlined_call_operand.vmem [shape: f32[2,8,32], index: 1, kind: input, shape index: {}]   ;;  %s3288_s2 = inlined_call_operand.vmem [shape: f32[2,1,8], index: 2, kind: input, shape index: {}]   ;;  %s3289_s3 = inlined_call_operand.vmem [shape: bf16[4,32,8], index: 3, kind: input, shape index: {}]   ;;  %s3290_s4 = inlined_call_operand.vmem [shape: bf16[4,32,8], index: 4, kind: input, shape index: {}]   ;;  %s3291_s5 = inlined_call_operand.vmem [shape: bf16[4,32,8], index: 5, kind: input, shape index: {}]   ;;  %s3292_s6 = inlined_call_operand.vmem [shape: bf16[4,8,32], index: 6, kind: input, shape index: {}]   ;;  %s3293_s7 = inlined_call_operand.vmem [shape: bf16[32,64], index: 7, kind: input, shape index: {}]   ;;  %s3294_s8 = inlined_call_operand.vmem [shape: f32[1,64], index: 8, kind: input, shape index: {}]   ;;  %s3295_s9 = inlined_call_operand.vmem [shape: bf16[64,32], index: 9, kind: input, shape index: {}]   ;;  %s3296_s10 = inlined_call_operand.vmem [shape: f32[1,32], index: 10, kind: input, shape index: {}]   ;;  %s3297_s11 = inlined_call_operand.vmem [shape: f32[1,32], index: 11, kind: input, shape index: {}]   ;;  %s3298_s12 = inlined_call_operand.vmem [shape: f32[1,32], index: 12, kind: input, shape index: {}]   ;;  %s3299_s13 = inlined_call_operand.vmem [shape: f32[1,32], index: 13, kind: input, shape index: {}]   ;;  %s3300_s14 = inlined_call_operand.vmem [shape: f32[1,32], index: 14, kind: input, shape index: {}]   ;;  %s3301_s15 = inlined_call_operand.hbm [shape: f32[2,8,32], index: 15, kind: output, shape index: {}]  }
   0x1   :  { %3306 = sst [smem:[#allocation11_spill]] %s3286_s0 }
   0x2   :  { %3307 = sst [smem:[#allocation12_spill]] %s3287_s1 }
   0x3   :  { %3308 = sst [smem:[#allocation13_spill]] %s3288_s2 }
   0x4   :  { %3309 = sst [smem:[#allocation14_spill]] %s3289_s3 }
   0x5   :  { %20 = vsyncpa [#allocation5], 0 }
   0x6   :  { %22 = vsyncpa [#allocation5 + $0x1], 0  ;;  %s2867_s18 = smov 0   ;;  %s2869_s19 = smov 0  }
   0x7   :  { %s2871_s20 = smov 0   ;;  %s2873_s21 = smov 0  }
   0x8   :  { %s2875_s22 = smov 0   ;;  %s2877_s23 = smov 0  }
   0x9 LB: > { %3310 = sst [smem:[#allocation7_spill]] %s2770_s20  ;;  %s2230_s24 = sadd.s32 4294967295, %s2782_s23   ;;  %s2782_s23 = sphi %s2877_s23, %s28_s23   ;;  %s2778_s22 = sphi %s2875_s22, %s3324_s22   ;;  %s2774_s21 = sphi %s2873_s21, %s3323_s21   ;;  %s2770_s20 = sphi %s2871_s20, %s3322_s20   ;;  %s2766_s19 = sphi %s2869_s19, %s3326_s19   ;;  %s2762_s18 = sphi %s2867_s18, %s3325_s18  }
   0xa   : > { %3311 = sst [smem:[#allocation8_spill]] %s2778_s22  ;;  %s2231_s25 = sadd.s32 4294967294, %s2782_s23  }
   0xb   : > { %s40_s26 = sadd.s32 1, %s2778_s22  ;;  %s381_s27 = sadd.s32 1, %s2770_s20 }
   0xc   : > { %p42_p0 = scmp.ge.s32.totalorder %s40_s26, 2  ;;  %p391_p1 = scmp.ne.s32.totalorder %s2770_s20, %s2766_s19 }
   0xd   : > { %p392_p2 = scmp.eq.s32.totalorder %s2230_s24, 1  ;;  %p397_p3 = scmp.ne.s32.totalorder %s2766_s19, %s2762_s18 }
   0xe   : > { %s3328_s26 = smov (%p42_p0, %s40_s26), 0  ;;  %p398_p5 = scmp.eq.s32.totalorder %s2231_s25, 1 }
   0xf   : > { %3312 = sst [smem:[#allocation9_spill]] %s3328_s26  ;;  %p2907_p4 = por %p392_p2, %p391_p1 }
  0x10   : > { %s376_s29 = ssub.s32 %s2778_s22, %s3328_s26  ;;  %p2234_p6 = scmp.ge.s32.totalorder %s2782_s23, 1 }
  0x11   : > { %p379_p7 = scmp.eq.s32.totalorder %s376_s29, 0  ;;  %p2914_p8 = por %p398_p5, %p397_p3 }
  0x12   : > { %p475_p9 = scmp.lt.s32.totalorder %s2782_s23, 3 }
  0x13   : > { %s2920_s16 = scalar_select %p379_p7, %s2770_s20, %s381_s27  }
  0x14   : > { %p476_p10 = pnand %p2234_p6, %p475_p9 }
  0x15   : > { %3315 = sst [smem:[#allocation10_spill]] %s2920_s16  ;;  %p532_p11 = scmp.lt.s32.totalorder (!%p476_p10), %s2774_s21, 1 }
  0x16   : > { %479 = sbr.rel (%p476_p10) target bundleno = 4327 (0x10e7), region = 80  ;;  %s3316_s0 = sld [smem:[#allocation11_spill]] (!%p476_p10) }
  0x17   : > { %s3317_s3 = sld [smem:[#allocation14_spill]] (!%p476_p10)  ;;  %s2786_s25 = smov (!%p476_p10), [#allocation4]  }
  0x18   : > { %s3319_s1 = sld [smem:[#allocation12_spill]] (!%p476_p10)  ;;  %s2710_s22 = sshll.u32 (!%p476_p10), %s2786_s25, 4  ;;  %s2711_s22 = int_to_ptr.vmem [resolvable:$false] %s2710_s22 }
  0x19   : > { %s3320_s2 = sld [smem:[#allocation13_spill]] (!%p476_p10) }
  0x1b   : > { %v2656_v0 = vld [vmem:[%s3290_s4 + $0x8] sm:$0xff]   ;;  %v2784_v1 = vmov 0.0   ;;  %v2657_v2 = vld [vmem:[%s3290_s4] sm:$0xff]   ;;  %vm2785_vm0 = vmmov 0   ;;  %s2937_s27 = scalar_select %p532_p11, %s2774_s21, 1  ;;  %vm569_vm1 = vcmask 261120  }
  0x1c   : > { %2411 = vmatprep.subr.bf16.mxu0 %v2784_v1  ;;  %2419 = vmatprep.subr.bf16.mxu1 %v2784_v1  ;;  %v2658_v4 = vld [vmem:[%s3290_s4 + $0x18] sm:$0xff]   ;;  %v2666_v6 = vld [vmem:[%s3291_s5 + $0x8] sm:$0xff]   ;;  %v2659_v7 = vld [vmem:[%s3290_s4 + $0x10] sm:$0xff]   ;;  %vm614_vm2 = vcmask 60416   ;;  %vm1108_vm3 = vcmask 64512   ;;  %vm1170_vm4 = vcmask 1043456  }
  0x1d   : > { %2412 = vmatpush3.bf16.msra.mxu0 %v2656_v0  ;;  %2415 = vmatprep.mubr.msk.bf16.mxu0 %vm2785_vm0, %v2784_v1  ;;  %s3305_s17 = sshll.u32 %s2937_s27, 3  ;;  %v2667_v8 = vld [vmem:[%s3291_s5] sm:$0xff]   ;;  %v2660_v9 = vld [vmem:[%s3290_s4 + $0x28] sm:$0xff]   ;;  %v2668_v10 = vld [vmem:[%s3291_s5 + $0x18] sm:$0xff]   ;;  %vm2048_vm6 = vcmask 523264  }
  0x1e   : > { %2413 = vmatprep.subr.bf16.mxu0 %v2784_v1  ;;  %2423 = vmatprep.mubr.msk.bf16.mxu1 %vm2785_vm0, %v2784_v1  ;;  %s535_s29 = scalar_lea.vmem %s3316_s0, %s3305_s17  ;;  %v2661_v11 = vld [vmem:[%s3290_s4 + $0x20] sm:$0xff]   ;;  %v2669_v12 = vld [vmem:[%s3291_s5 + $0x10] sm:$0xff]   ;;  %v2662_v13 = vld [vmem:[%s3290_s4 + $0x38] sm:$0xff]   ;;  %s3318_s17 = sshll.u32 %s2937_s27, 3 }
  0x1f   : > { %v551_v3 = vld [vmem:[%s535_s29] sm:$0xff]  ;;  %2420 = vmatpush3.bf16.msra.mxu1 %v2666_v6  ;;  %v2670_v14 = vld [vmem:[%s3291_s5 + $0x28] sm:$0xff]   ;;  %v2663_v15 = vld [vmem:[%s3290_s4 + $0x30] sm:$0xff]   ;;  %s542_s16 = scalar_lea.vmem %s3319_s1, %s3318_s17  ;;  %s545_s20 = scalar_lea.vmem %s3320_s2, %s2937_s27 }
  0x20   : > { %v2949_v5 = vpack.c.bf16 %v551_v3, %v551_v3  ;;  %2421 = vmatprep.subr.bf16.mxu1 %v2784_v1  ;;  %v2664_v16 = vld [vmem:[%s3317_s3 + $0x8] sm:$0xff]   ;;  %v2665_v17 = vld [vmem:[%s3317_s3] sm:$0xff]   ;;  %v2672_v21 = vld [vmem:[%s3291_s5 + $0x38] sm:$0xff]   ;;  %s529_s27 = sand.u32 1, %s2766_s19   ;;  %s2340_s17 = sshll.u32 %s2774_s21, 7 }
  0x21   : > { %2414 = vmatpush3.bf16.msra.mxu0 %v2657_v2  ;;  %v3027_v18 = vld [vmem:[%s542_s16] sm:$0xff]  ;;  %v2673_v22 = vld [vmem:[%s3291_s5 + $0x30] sm:$0xff]   ;;  %v2674_v58 = vld [vmem:[%s3317_s3 + $0x18] sm:$0xff]   ;;  %s2235_s16 = sshll.u32 %s529_s27, 3  ;;  %s2136_s2 = scalar_lea.hbm %s3301_s15, %s2340_s17 }
  0x22   : > { %2427 = vmatprep.subr.bf16.mxu0 %v2784_v1  ;;  %v3032_v19 = vpack.c.bf16 %v3027_v18, %v3027_v18  ;;  %v2671_v20 = vld [vmem:[%s3291_s5 + $0x20] sm:$0xff]   ;;  %v2675_v62 = vld [vmem:[%s3317_s3 + $0x10] sm:$0xff]   ;;  %s531_s29 = scalar_lea.vmem [#allocation4], %s2235_s16  ;;  %s2712_s21 = scalar_lea.vmem %s2711_s22, 256 }
  0x23   : > { %2422 = vmatpush3.bf16.msra.mxu1 %v2667_v8 }
  0x24   : > { %2416 = vmatmul.mubr.msk.bf16.vlgmr.msra.gmra.mxu0 %vm569_vm1, %v2949_v5  ;;  %2435 = vmatprep.subr.bf16.mxu1 %v2784_v1 }
  0x25   : > { %2428 = vmatpush3.bf16.msra.mxu0 %v2658_v4  ;;  %2431 = vmatprep.mubr.msk.bf16.mxu0 %vm2785_vm0, %v2784_v1 }
  0x26   : > { %2429 = vmatprep.subr.bf16.mxu0 %v2784_v1  ;;  %2424 = vmatmul.mubr.msk.bf16.vlgmr.msra.gmra.mxu1 %vm569_vm1, %v2949_v5 }
  0x27   : > { %2436 = vmatpush3.bf16.msra.mxu1 %v2668_v10  ;;  %2439 = vmatprep.mubr.msk.bf16.mxu1 %vm2785_vm0, %v2784_v1 }
  0x28   : > { %2437 = vmatprep.subr.bf16.mxu1 %v2784_v1 }
  0x29   : > { %2430 = vmatpush3.bf16.msra.mxu0 %v2659_v7 }
  0x2a   : > { %2443 = vmatprep.subr.bf16.mxu0 %v2784_v1 }
  0x2b   : > { %2438 = vmatpush3.bf16.msra.mxu1 %v2669_v12 }
  0x2c   : > { %2432 = vmatmul.mubr.msk.bf16.vlgmr.msra.gmra.mxu0 %vm569_vm1, %v2949_v5  ;;  %2451 = vmatprep.subr.bf16.mxu1 %v2784_v1 }
  0x2d   : > { %2444 = vmatpush3.bf16.msra.mxu0 %v2660_v9  ;;  %2447 = vmatprep.mubr.msk.bf16.mxu0 %vm2785_vm0, %v2784_v1 }
  0x2e   : > { %2445 = vmatprep.subr.bf16.mxu0 %v2784_v1  ;;  %2440 = vmatmul.mubr.msk.bf16.vlgmr.msra.gmra.mxu1 %vm569_vm1, %v2949_v5 }
  0x2f   : > { %2452 = vmatpush3.bf16.msra.mxu1 %v2670_v14  ;;  %2455 = vmatprep.mubr.msk.bf16.mxu1 %vm2785_vm0, %v2784_v1  ;;  %v1036_v14 = vld [vmem:[%s545_s20] sm:$0x1]  ;;  %s2138_s20 = sshll.u32 %s531_s29, 4  ;;  %s2139_s20 = int_to_ptr.vmem [resolvable:$true] %s2138_s20 }
  0x30   : > { %2453 = vmatprep.subr.bf16.mxu1 %v2784_v1  ;;  %vm1037_vm5 = vcmp.eq.f32.partialorder %v1036_v14, 0.0  ;;  %s2706_s24 = scalar_lea.vmem %s2139_s20, 128  ;;  %p2713_p1 = scmp.lt.s32.totalorder %s2139_s20, %s2711_s22 }
  0x31   : > { %2446 = vmatpush3.bf16.msra.mxu0 %v2661_v11  ;;  %p2707_p12 = scmp.ne.s32.totalorder %s2139_s20, %s2706_s24  ;;  %p2714_p2 = scmp.lt.s32.totalorder %s2712_s21, %s2706_s24 }
  0x32   : > { %2459 = vmatprep.subr.bf16.mxu0 %v2784_v1 }
  0x33   : > { %2454 = vmatpush3.bf16.msra.mxu1 %v2671_v20  ;;  %p2708_p13 = pnand %p2707_p12, %p2907_p4  ;;  %p2715_p3 = por %p2714_p2, %p2713_p1 }
  0x34   : > { %2448 = vmatmul.mubr.msk.bf16.vlgmr.msra.gmra.mxu0 %vm569_vm1, %v2949_v5  ;;  %2467 = vmatprep.subr.bf16.mxu1 %v2784_v1 }
  0x35   : > { %2460 = vmatpush3.bf16.msra.mxu0 %v2662_v13  ;;  %2463 = vmatprep.mubr.msk.bf16.mxu0 %vm2785_vm0, %v2784_v1  ;;  %v1103_v13 = vlaneseq  ;;  %p2709_p0 = pneg %p2708_p13 }
  0x36   : > { %2461 = vmatprep.subr.bf16.mxu0 %v2784_v1  ;;  %2456 = vmatmul.mubr.msk.bf16.vlgmr.msra.gmra.mxu1 %vm569_vm1, %v2949_v5 }
  0x37   : > { %2468 = vmatpush3.bf16.msra.mxu1 %v2672_v21  ;;  %2471 = vmatprep.mubr.msk.bf16.mxu1 %vm2785_vm0, %v2784_v1  ;;  %p2716_p5 = pnand %p2715_p3, %p2709_p0 }
  0x38   : > { %2469 = vmatprep.subr.bf16.mxu1 %v2784_v1 }
  0x39   : > { %2462 = vmatpush3.bf16.msra.mxu0 %v2663_v15  ;;  %v1104_v15 = vshrl.u32 %v1103_v13, 7 }
  0x3a   : > { %2475 = vmatprep.subr.bf16.mxu0 %v2784_v1 }
  0x3b   : > { %2470 = vmatpush3.bf16.msra.mxu1 %v2673_v22 }
  0x3c   : > { %2464 = vmatmul.mubr.msk.bf16.vlgmr.msra.gmra.mxu0 %vm569_vm1, %v2949_v5  ;;  %2483 = vmatprep.subr.bf16.mxu1 %v2784_v1 }
  0x3d   : > { %2476 = vmatpush3.bf16.msra.mxu0 %v2664_v16  ;;  %2479 = vmatprep.mubr.msk.bf16.mxu0 %vm2785_vm0, %v2784_v1  ;;  %v1105_v16 = vsub.s32 0, %v1104_v15 }
  0x3e   : > { %2477 = vmatprep.subr.bf16.mxu0 %v2784_v1  ;;  %2472 = vmatmul.mubr.msk.bf16.vlgmr.msra.gmra.mxu1 %vm569_vm1, %v2949_v5 }
  0x3f   : > { %2485 = vmatprep.mubr.msk.bf16.mxu1 %vm2785_vm0, %v2784_v1 }
  0x41   : > { %2478 = vmatpush3.bf16.msra.mxu0 %v2665_v17  ;;  %v1038_v17 = vsel %vm1037_vm5, -1e+09, %v2784_v1 }
  0x42   : > { %2489 = vmatprep.subr.bf16.mxu0 %v2784_v1  ;;  %v3093_v20 = vrot.slane %v1038_v17, %v1105_v16 }
  0x44   : > { %2480 = vmatmul.mubr.msk.bf16.vlgmr.msra.gmra.mxu0 %vm569_vm1, %v3032_v19 }
  0x45   : > { %2491 = vmatprep.mubr.msk.bf16.mxu0 %vm2785_vm0, %v2784_v1 }
  0xe4   : > { %v607_v23 = vpop.f32.mrf.mxu0 }
  0xe5   : > { %v613_v24 = vpack.c.bf16 %v607_v23, %v607_v23 }
  0xe6   : > { %v2417_v25 = vpop.f32.mrf.mxu0  ;;  %v666_v32 = vpop.f32.mrf.mxu1 }
  0xe7   : > { %615 = vst.msk [vmem:[#allocation2] sm:$0xf] %vm614_vm2, %v613_v24  ;;  %v672_v34 = vpack.c.bf16 %v666_v32, %v666_v32 }
  0xe8   : > { %v610_v26 = vpop.f32.mrf.mxu0  ;;  %v2425_v36 = vpop.f32.mrf.mxu1 }
  0xe9   : > { %673 = vst.msk [vmem:[#allocation3] sm:$0xf] %vm614_vm2, %v672_v34 }
  0xea   : > { %v2418_v27 = vpop.f32.mrf.mxu0  ;;  %v669_v38 = vpop.f32.mrf.mxu1 }
  0xec   : > { %v725_v28 = vpop.f32.mrf.mxu0  ;;  %v2426_v40 = vpop.f32.mrf.mxu1 }
  0xed   : > { %v731_v29 = vpack.c.bf16 %v725_v28, %v725_v28 }
  0xee   : > { %v2433_v30 = vpop.f32.mrf.mxu0  ;;  %v1099_v31 = vld [vmem:[#allocation2] sm:$0xf]  ;;  %v785_v43 = vpop.f32.mrf.mxu1 }
  0xef   : > { %733 = vst.msk [vmem:[#allocation2 + $0x4] sm:$0xf] %vm614_vm2, %v731_v29  ;;  %v1113_v33 = vsel %vm1108_vm3, %v1099_v31, 0  ;;  %v791_v44 = vpack.c.bf16 %v785_v43, %v785_v43 }
  0xf0   : > { %v728_v35 = vpop.f32.mrf.mxu0  ;;  %2484 = vmatpush3.bf16.xpose.msra.mxu1 %v1113_v33  ;;  %v2441_v46 = vpop.f32.mrf.mxu1  ;;  %v1100_v47 = vld [vmem:[#allocation3] sm:$0xf] }
  0xf1   : > { %2495 = vmatprep.subr.bf16.mxu1 %v2784_v1  ;;  %793 = vst.msk [vmem:[#allocation3 + $0x4] sm:$0xf] %vm614_vm2, %v791_v44  ;;  %v1172_v48 = vsel %vm1170_vm4, %v1100_v47, 0 }
  0xf2   : > { %v2434_v37 = vpop.f32.mrf.mxu0  ;;  %v788_v50 = vpop.f32.mrf.mxu1  ;;  %2490 = vmatpush3.bf16.msra.mxu0 %v1172_v48 }
  0xf3   : > { %2503 = vmatprep.subr.bf16.mxu0 %v2784_v1 }
  0xf4   : > { %v845_v39 = vpop.f32.mrf.mxu0  ;;  %v2442_v52 = vpop.f32.mrf.mxu1 }
  0xf5   : > { %v851_v41 = vpack.c.bf16 %v845_v39, %v845_v39 }
  0xf6   : > { %v2449_v42 = vpop.f32.mrf.mxu0  ;;  %v905_v3 = vpop.f32.mrf.mxu1  ;;  %v1274_v39 = vld [vmem:[#allocation2 + $0x4] sm:$0xf] }
  0xf7   : > { %853 = vst.msk [vmem:[#allocation2 + $0x8] sm:$0xf] %vm614_vm2, %v851_v41  ;;  %v911_v4 = vpack.c.bf16 %v905_v3, %v905_v3  ;;  %v1282_v41 = vsel %vm1108_vm3, %v1274_v39, 0 }
  0xf8   : > { %v848_v45 = vpop.f32.mrf.mxu0  ;;  %v1276_v0 = vld [vmem:[#allocation3 + $0x4] sm:$0xf]  ;;  %v2457_v5 = vpop.f32.mrf.mxu1 }
  0xf9   : > { %v1340_v2 = vsel %vm1170_vm4, %v1276_v0, 0  ;;  %913 = vst.msk [vmem:[#allocation3 + $0x8] sm:$0xf] %vm614_vm2, %v911_v4 }
  0xfa   : > { %v2450_v49 = vpop.f32.mrf.mxu0  ;;  %v908_v6 = vpop.f32.mrf.mxu1 }
  0xfc   : > { %v965_v51 = vpop.f32.mrf.mxu0  ;;  %v2458_v7 = vpop.f32.mrf.mxu1 }
  0xfd   : > { %v971_v53 = vpack.c.bf16 %v965_v51, %v965_v51  ;;  %v2676_v7 = vld [vmem:[%s3317_s3 + $0x28] sm:$0xff]  }
  0xfe   : > { %v2465_v54 = vpop.f32.mrf.mxu0  ;;  %v1025_v8 = vpop.f32.mrf.mxu1  ;;  %v1535_v3 = vld [vmem:[#allocation2 + $0x8] sm:$0xf] }
  0xff   : > { %973 = vst.msk [vmem:[#allocation2 + $0xc] sm:$0xf] %vm614_vm2, %v971_v53  ;;  %v1031_v9 = vpack.c.bf16 %v1025_v8, %v1025_v8  ;;  %v1543_v5 = vsel %vm1108_vm3, %v1535_v3, 0 }
 0x100   : > { %v968_v55 = vpop.f32.mrf.mxu0  ;;  %v2473_v10 = vpop.f32.mrf.mxu1  ;;  %v1537_v14 = vld [vmem:[#allocation3 + $0x8] sm:$0xf] }
 0x101   : > { %1033 = vst.msk [vmem:[#allocation3 + $0xc] sm:$0xf] %vm614_vm2, %v1031_v9  ;;  %v1601_v16 = vsel %vm1170_vm4, %v1537_v14, 0 }
 0x102   : > { %v2466_v56 = vpop.f32.mrf.mxu0  ;;  %v1028_v11 = vpop.f32.mrf.mxu1 }
 0x103   : > { %v2677_v11 = vld [vmem:[%s3317_s3 + $0x20] sm:$0xff]  }
 0x104   : > { %v1093_v57 = vpop.f32.mrf.mxu0  ;;  %v2474_v12 = vpop.f32.mrf.mxu1 }
 0x105   : > { %v1101_v59 = vpack.c.bf16 %v1093_v57, %v1093_v57 }
 0x106   : > { %v2481_v60 = vpop.f32.mrf.mxu0 }
 0x107   : > { %2486 = vmatmul.mubr.msk.bf16.vlgmr.msra.gmra.mxu1 %vm1108_vm3, %v1101_v59 }
 0x108   : > { %v1096_v61 = vpop.f32.mrf.mxu0  ;;  %2496 = vmatpush3.bf16.msra.mxu1 %v2674_v58  ;;  %2499 = vmatprep.mubr.msk.bf16.mxu1 %vm2785_vm0, %v2784_v1  ;;  %v2300_v58 = vld [vmem:[%s3292_s6 + $0x4] sm:$0xf] }
 0x109   : > { %2497 = vmatprep.subr.bf16.mxu1 %v2784_v1  ;;  %v1389_v59 = vsel %vm1170_vm4, %v2300_v58, 0 }
 0x10a   : > { %v2482_v63 = vpop.f32.mrf.mxu0 }
 0x10c   : > { %2498 = vmatpush3.bf16.msra.mxu1 %v2675_v62  ;;  %v1215_v62 = vld [vmem:[%s3292_s6] sm:$0xf] }
 0x10d   : > { %2509 = vmatprep.subr.bf16.mxu1 %v2784_v1 }
 0x10f   : > { %2500 = vmatmul.mubr.msk.bf16.vlgmr.msra.gmra.mxu1 %vm569_vm1, %v3032_v19 }
 0x110   : > { %2510 = vmatpush3.bf16.msra.mxu1 %v1340_v2  ;;  %2511 = vmatprep.mubr.msk.bf16.mxu1 %vm2785_vm0, %v2784_v1  ;;  %v1435_v2 = vsel %vm1170_vm4, %v1215_v62, 0 }
 0x111   : > { %2521 = vmatprep.subr.bf16.mxu1 %v2784_v1 }
 0x1c7   : > { %v1149_v21 = vpop.f32.mrf.mxu1 }
 0x1c8   : > { %v1150_v22 = vadd.f32 %v1149_v21, %v3093_v20 }
 0x1c9   : > { %v2487_v23 = vpop.f32.mrf.mxu1 }
 0x1ca   : > { %v1155_v24 = vsel %vm1108_vm3, %v1150_v22, -inf }
 0x1cb   : > { %1156 = vmax.xlane.f32.xlu0 %v1155_v24  ;;  %v1152_v25 = vpop.f32.mrf.mxu1 }
 0x1cd   : > { %v2488_v26 = vpop.f32.mrf.mxu1 }
 0x1cf   : > { %v1267_v32 = vpop.f32.mrf.mxu1 }
 0x1d0   : > { %v1277_v42 = vpack.c.bf16 %v1267_v32, %v1267_v32 }
 0x1d1   : > { %v2501_v33 = vpop.f32.mrf.mxu1 }
 0x1d3   : > { %v1270_v34 = vpop.f32.mrf.mxu1 }
 0x1d5   : > { %v2502_v35 = vpop.f32.mrf.mxu1 }
 0x254   : > { %v1157_v27 = vpop.xlane.xlu0 %1156 }
 0x255   : > { %v1158_v28 = vsub.f32 %v1150_v22, %v1157_v27 }
 0x257   : > { %v1159_v29 = vmul.f32 1.442695, %v1158_v28 }
 0x259   : > { %2686 = vpow2.f32 %v1159_v29 }
 0x266   : > { %v2687_v30 = vpop.eup %2686 }
 0x267   : > { %v1161_v31 = vsel %vm1108_vm3, %v2687_v30, 0.0 }
 0x268   : > { %1162 = vadd.xlane.f32.xlu0 %v1161_v31 }
 0x2f1   : > { %v1163_v36 = vpop.xlane.xlu0 %1162 }
 0x2f2   : > { %2688 = vrcp.f32 %v1163_v36 }
 0x2ff   : > { %v2689_v37 = vpop.eup %2688 }
 0x300   : > { %v1165_v38 = vmul.f32 %v2689_v37, %v2687_v30 }
 0x302   : > { %v1166_v40 = vpack.c.bf16 %v1165_v38, %v1165_v38 }
 0x304   : > { %2492 = vmatmul.mubr.msk.bf16.vlgmr.msra.gmra.mxu0 %vm1108_vm3, %v1166_v40 }
 0x305   : > { %2504 = vmatpush3.bf16.xpose.msra.mxu0 %v1282_v41  ;;  %2505 = vmatprep.mubr.msk.bf16.mxu0 %vm2785_vm0, %v2784_v1 }
 0x306   : > { %2515 = vmatprep.subr.bf16.mxu0 %v2784_v1 }
 0x30c   : > { %2506 = vmatmul.mubr.msk.bf16.vlgmr.msra.gmra.mxu0 %vm1108_vm3, %v1277_v42  ;;  %v2312_v42 = vld [vmem:[%s3292_s6 + $0x8] sm:$0xf] }
 0x30d   : > { %2517 = vmatprep.mubr.msk.bf16.mxu0 %vm2785_vm0, %v2784_v1  ;;  %2516 = vmatpush3.bf16.msra.mxu0 %v1389_v59 }
 0x30e   : > { %2527 = vmatprep.subr.bf16.mxu0 %v2784_v1 }
 0x3c4   : > { %v1208_v43 = vpop.f32.mrf.mxu0 }
 0x3c5   : > { %v1214_v4 = vpack.c.bf16 %v1208_v43, %v1208_v43  ;;  %v1650_v43 = vsel %vm1170_vm4, %v2312_v42, 0  ;;  %v2680_v42 = vld [vmem:[%s3293_s7 + $0x8] sm:$0xff]  }
 0x3c6   : > { %v2493_v44 = vpop.f32.mrf.mxu0 }
 0x3c8   : > { %v1211_v45 = vpop.f32.mrf.mxu0 }
 0x3ca   : > { %v2494_v46 = vpop.f32.mrf.mxu0 }
 0x3cc   : > { %v1318_v47 = vpop.f32.mrf.mxu0 }
 0x3cd   : > { %v1319_v48 = vadd.f32 %v1318_v47, %v3093_v20  ;;  %v2678_v47 = vld [vmem:[%s3317_s3 + $0x38] sm:$0xff]  }
 0x3ce   : > { %v2507_v49 = vpop.f32.mrf.mxu0 }
 0x3cf   : > { %v1324_v50 = vsel %vm1108_vm3, %v1319_v48, -inf  ;;  %v2679_v49 = vld [vmem:[%s3317_s3 + $0x30] sm:$0xff]   ;;  %s2124_s3 = scalar_lea.sflag [#allocation5], %s529_s27 }
 0x3d0   : > { %1325 = vmax.xlane.f32.xlu1 %v1324_v50  ;;  %v1321_v51 = vpop.f32.mrf.mxu0  ;;  %v1753_v50 = vld [vmem:[#allocation3 + $0xc] sm:$0xf] }
 0x3d1   : > { %v1817_v51 = vsel %vm1170_vm4, %v1753_v50, 0 }
 0x3d2   : > { %v2508_v52 = vpop.f32.mrf.mxu0 }
 0x459   : > { %v1326_v53 = vpop.xlane.xlu1 %1325 }
 0x45a   : > { %v1327_v54 = vsub.f32 %v1319_v48, %v1326_v53  ;;  %v1751_v53 = vld [vmem:[#allocation2 + $0xc] sm:$0xf] }
 0x45c   : > { %v1328_v55 = vmul.f32 1.442695, %v1327_v54 }
 0x45e   : > { %2690 = vpow2.f32 %v1328_v55 }
 0x46b   : > { %v2691_v56 = vpop.eup %2690 }
 0x46c   : > { %v1330_v57 = vsel %vm1108_vm3, %v2691_v56, 0.0 }
 0x46d   : > { %1331 = vadd.xlane.f32.xlu1 %v1330_v57 }
 0x4f6   : > { %v1332_v60 = vpop.xlane.xlu1 %1331 }
 0x4f7   : > { %2692 = vrcp.f32 %v1332_v60 }
 0x504   : > { %v2693_v61 = vpop.eup %2692 }
 0x505   : > { %v1334_v63 = vmul.f32 %v2693_v61, %v2691_v56  ;;  %v1759_v56 = vsel %vm1108_vm3, %v1751_v53, 0 }
 0x507   : > { %v1335_v0 = vpack.c.bf16 %v1334_v63, %v1334_v63 }
 0x509   : > { %2512 = vmatmul.mubr.msk.bf16.vlgmr.msra.gmra.mxu1 %vm1108_vm3, %v1335_v0 }
 0x50a   : > { %2522 = vmatpush3.bf16.msra.mxu1 %v1435_v2  ;;  %2523 = vmatprep.mubr.msk.bf16.mxu1 %vm2785_vm0, %v2784_v1 }
 0x50b   : > { %2535 = vmatprep.subr.bf16.mxu1 %v2784_v1 }
 0x511   : > { %2524 = vmatmul.mubr.msk.bf16.vlgmr.msra.gmra.mxu1 %vm1108_vm3, %v1214_v4 }
 0x512   : > { %2536 = vmatpush3.bf16.xpose.msra.mxu1 %v1543_v5  ;;  %2537 = vmatprep.mubr.msk.bf16.mxu1 %vm2785_vm0, %v2784_v1 }
 0x513   : > { %2547 = vmatprep.subr.bf16.mxu1 %v2784_v1 }
 0x5c9   : > { %v1376_v6 = vpop.f32.mrf.mxu1 }
 0x5ca   : > { %v1382_v8 = vpack.c.bf16 %v1376_v6, %v1376_v6 }
 0x5cb   : > { %v2513_v9 = vpop.f32.mrf.mxu1 }
 0x5cc   : > { %2518 = vmatmul.mubr.msk.bf16.vlgmr.msra.gmra.mxu0 %vm1108_vm3, %v1382_v8 }
 0x5cd   : > { %2528 = vmatpush3.bf16.msra.mxu0 %v2676_v7  ;;  %v1379_v10 = vpop.f32.mrf.mxu1  ;;  %2531 = vmatprep.mubr.msk.bf16.mxu0 %vm2785_vm0, %v2784_v1 }
 0x5ce   : > { %2529 = vmatprep.subr.bf16.mxu0 %v2784_v1 }
 0x5cf   : > { %v2514_v12 = vpop.f32.mrf.mxu1 }
 0x5d1   : > { %2530 = vmatpush3.bf16.msra.mxu0 %v2677_v11  ;;  %v3137_v13 = vpop.f32.mrf.mxu1 }
 0x5d2   : > { %2541 = vmatprep.subr.bf16.mxu0 %v2784_v1 }
 0x5d3   : > { %v2525_v15 = vpop.f32.mrf.mxu1 }
 0x5d4   : > { %2532 = vmatmul.mubr.msk.bf16.vlgmr.msra.gmra.mxu0 %vm569_vm1, %v3032_v19 }
 0x5d5   : > { %2542 = vmatpush3.bf16.msra.mxu0 %v1601_v16  ;;  %v1474_v17 = vpop.f32.mrf.mxu1  ;;  %2543 = vmatprep.mubr.msk.bf16.mxu0 %vm2785_vm0, %v2784_v1 }
 0x5d6   : > { %2553 = vmatprep.subr.bf16.mxu0 %v2784_v1  ;;  %v2323_v17 = vld [vmem:[%s3292_s6 + $0xc] sm:$0xf] }
 0x5d7   : > { %v2526_v21 = vpop.f32.mrf.mxu1 }
 0x68c   : > { %v3146_v22 = vpop.f32.mrf.mxu0 }
 0x68d   : > { %v1472_v63 = vadd.f32 %v3137_v13, %v3146_v22 }
 0x68e   : > { %v2519_v23 = vpop.f32.mrf.mxu0 }
 0x690   : > { %v1428_v24 = vpop.f32.mrf.mxu0 }
 0x692   : > { %v2520_v25 = vpop.f32.mrf.mxu0 }
 0x694   : > { %v1528_v26 = vpop.f32.mrf.mxu0 }
 0x695   : > { %v1538_v27 = vpack.c.bf16 %v1528_v26, %v1528_v26 }
 0x696   : > { %v2533_v28 = vpop.f32.mrf.mxu0 }
 0x697   : > { %2538 = vmatmul.mubr.msk.bf16.vlgmr.msra.gmra.mxu1 %vm1108_vm3, %v1538_v27 }
 0x698   : > { %v1531_v29 = vpop.f32.mrf.mxu0  ;;  %2549 = vmatprep.mubr.msk.bf16.mxu1 %vm2785_vm0, %v2784_v1  ;;  %2548 = vmatpush3.bf16.msra.mxu1 %v1650_v43  ;;  %v2682_v43 = vld [vmem:[%s3295_s9 + $0x18] sm:$0xff]  }
 0x699   : > { %2561 = vmatprep.subr.bf16.mxu1 %v2784_v1 }
 0x69a   : > { %v2534_v30 = vpop.f32.mrf.mxu0 }
 0x757   : > { %v1579_v31 = vpop.f32.mrf.mxu1 }
 0x758   : > { %v1580_v32 = vadd.f32 %v1579_v31, %v3093_v20 }
 0x759   : > { %v2539_v33 = vpop.f32.mrf.mxu1 }
 0x75a   : > { %v1585_v34 = vsel %vm1108_vm3, %v1580_v32, -inf }
 0x75b   : > { %1586 = vmax.xlane.f32.xlu0 %v1585_v34  ;;  %v1582_v35 = vpop.f32.mrf.mxu1 }
 0x75d   : > { %v2540_v36 = vpop.f32.mrf.mxu1 }
 0x7e4   : > { %v1587_v37 = vpop.xlane.xlu0 %1586 }
 0x7e5   : > { %v1588_v38 = vsub.f32 %v1580_v32, %v1587_v37 }
 0x7e7   : > { %v1589_v39 = vmul.f32 1.442695, %v1588_v38 }
 0x7e9   : > { %2694 = vpow2.f32 %v1589_v39 }
 0x7f6   : > { %v2695_v40 = vpop.eup %2694 }
 0x7f7   : > { %v1591_v41 = vsel %vm1108_vm3, %v2695_v40, 0.0 }
 0x7f8   : > { %1592 = vadd.xlane.f32.xlu1 %v1591_v41 }
 0x881   : > { %v1593_v44 = vpop.xlane.xlu1 %1592 }
 0x882   : > { %2696 = vrcp.f32 %v1593_v44  ;;  %v2683_v44 = vld [vmem:[%s3295_s9 + $0x10] sm:$0xff]  }
 0x88f   : > { %v2697_v45 = vpop.eup %2696 }
 0x890   : > { %v1595_v46 = vmul.f32 %v2697_v45, %v2695_v40 }
 0x892   : > { %v1596_v48 = vpack.c.bf16 %v1595_v46, %v1595_v46 }
 0x894   : > { %2544 = vmatmul.mubr.msk.bf16.vlgmr.msra.gmra.mxu0 %vm1108_vm3, %v1596_v48 }
 0x895   : > { %2554 = vmatpush3.bf16.msra.mxu0 %v2678_v47  ;;  %2557 = vmatprep.mubr.msk.bf16.mxu0 %vm2785_vm0, %v2784_v1 }
 0x896   : > { %2555 = vmatprep.subr.bf16.mxu0 %v2784_v1 }
 0x899   : > { %2556 = vmatpush3.bf16.msra.mxu0 %v2679_v49  ;;  %v2325_v49 = vld [vmem:[%s3297_s11] ss:$0 sm:$0xff] }
 0x89a   : > { %2567 = vmatprep.subr.bf16.mxu0 %v2784_v1 }
 0x89c   : > { %2558 = vmatmul.mubr.msk.bf16.vlgmr.msra.gmra.mxu0 %vm569_vm1, %v3032_v19 }
 0x89d   : > { %2568 = vmatpush3.bf16.msra.mxu0 %v1817_v51  ;;  %2569 = vmatprep.mubr.msk.bf16.mxu0 %vm2785_vm0, %v2784_v1  ;;  %v2326_v51 = vld [vmem:[%s3298_s12] ss:$0 sm:$0xff] }
 0x89e   : > { %2579 = vmatprep.subr.bf16.mxu0 %v2784_v1 }
 0x954   : > { %v1637_v52 = vpop.f32.mrf.mxu0 }
 0x955   : > { %v1643_v54 = vpack.c.bf16 %v1637_v52, %v1637_v52 }
 0x956   : > { %v2545_v55 = vpop.f32.mrf.mxu0 }
 0x957   : > { %2550 = vmatmul.mubr.msk.bf16.vlgmr.msra.gmra.mxu1 %vm1108_vm3, %v1643_v54  ;;  %v2684_v55 = vld [vmem:[%s3295_s9 + $0x8] sm:$0xff]  }
 0x958   : > { %2562 = vmatpush3.bf16.xpose.msra.mxu1 %v1759_v56  ;;  %v1640_v57 = vpop.f32.mrf.mxu0  ;;  %2563 = vmatprep.mubr.msk.bf16.mxu1 %vm2785_vm0, %v2784_v1  ;;  %v2685_v56 = vld [vmem:[%s3295_s9] sm:$0xff]  }
 0x959   : > { %2573 = vmatprep.subr.bf16.mxu1 %v2784_v1  ;;  %v2327_v57 = vld [vmem:[%s3294_s8] ss:$0 sm:$0xff] }
 0x95a   : > { %v2546_v19 = vpop.f32.mrf.mxu0 }
 0x95c   : > { %v1744_v58 = vpop.f32.mrf.mxu0 }
 0x95d   : > { %v1754_v59 = vpack.c.bf16 %v1744_v58, %v1744_v58 }
 0x95e   : > { %v2559_v60 = vpop.f32.mrf.mxu0 }
 0x95f   : > { %2564 = vmatmul.mubr.msk.bf16.vlgmr.msra.gmra.mxu1 %vm1108_vm3, %v1754_v59 }
 0x960   : > { %v1747_v61 = vpop.f32.mrf.mxu0  ;;  %2575 = vmatprep.mubr.msk.bf16.mxu1 %vm2785_vm0, %v2784_v1 }
 0x962   : > { %v2560_v62 = vpop.f32.mrf.mxu0 }
 0xa17   : > { %v1686_v0 = vpop.f32.mrf.mxu1 }
 0xa18   : > { %v1692_v2 = vadd.f32 %v1686_v0, %v1472_v63 }
 0xa19   : > { %v2551_v3 = vpop.f32.mrf.mxu1 }
 0xa1b   : > { %v1689_v4 = vpop.f32.mrf.mxu1 }
 0xa1d   : > { %v2552_v5 = vpop.f32.mrf.mxu1 }
 0xa1f   : > { %v1795_v6 = vpop.f32.mrf.mxu1 }
 0xa20   : > { %v1796_v7 = vadd.f32 %v1795_v6, %v3093_v20  ;;  %v1866_v20 = vsel %vm1170_vm4, %v2323_v17, 0  ;;  %v2337_v17 = vld [vmem:[%s3299_s13] ss:$0 sm:$0xff] }
 0xa21   : > { %v2565_v8 = vpop.f32.mrf.mxu1  ;;  %2574 = vmatpush3.bf16.msra.mxu1 %v1866_v20 }
 0xa22   : > { %v1801_v9 = vsel %vm1108_vm3, %v1796_v7, -inf  ;;  %2587 = vmatprep.subr.bf16.mxu1 %v2784_v1 }
 0xa23   : > { %1802 = vmax.xlane.f32.xlu0 %v1801_v9  ;;  %v1798_v10 = vpop.f32.mrf.mxu1 }
 0xa25   : > { %v2566_v11 = vpop.f32.mrf.mxu1 }
 0xaac   : > { %v1803_v12 = vpop.xlane.xlu0 %1802 }
 0xaad   : > { %v1804_v14 = vsub.f32 %v1796_v7, %v1803_v12 }
 0xaaf   : > { %v1805_v15 = vmul.f32 1.442695, %v1804_v14 }
 0xab1   : > { %2698 = vpow2.f32 %v1805_v15 }
 0xabe   : > { %v2699_v16 = vpop.eup %2698 }
 0xabf   : > { %v1807_v13 = vsel %vm1108_vm3, %v2699_v16, 0.0 }
 0xac0   : > { %1808 = vadd.xlane.f32.xlu1 %v1807_v13 }
 0xb49   : > { %v1809_v21 = vpop.xlane.xlu1 %1808 }
 0xb4a   : > { %2700 = vrcp.f32 %v1809_v21  ;;  %v2338_v21 = vld [vmem:[%s3300_s14] ss:$0 sm:$0xff] }
 0xb57   : > { %v2701_v22 = vpop.eup %2700 }
 0xb58   : > { %v1811_v23 = vmul.f32 %v2701_v22, %v2699_v16 }
 0xb5a   : > { %v1812_v24 = vpack.c.bf16 %v1811_v23, %v1811_v23 }
 0xb5c   : > { %2570 = vmatmul.mubr.msk.bf16.vlgmr.msra.gmra.mxu0 %vm1108_vm3, %v1812_v24 }
 0xb5d   : > { %2583 = vmatprep.mubr.msk.bf16.mxu0 %vm2785_vm0, %v2784_v1  ;;  %2580 = vmatpush3.bf16.msra.mxu0 %v2680_v42 }
 0xb5e   : > { %2581 = vmatprep.subr.bf16.mxu0 %v2784_v1 }
 0xc1c   : > { %v1853_v25 = vpop.f32.mrf.mxu0 }
 0xc1d   : > { %v1859_v26 = vpack.c.bf16 %v1853_v25, %v1853_v25 }
 0xc1e   : > { %v2571_v27 = vpop.f32.mrf.mxu0 }
 0xc1f   : > { %2576 = vmatmul.mubr.msk.bf16.vlgmr.msra.gmra.mxu1 %vm1108_vm3, %v1859_v26 }
 0xc20   : > { %v1856_v28 = vpop.f32.mrf.mxu0  ;;  %2595 = vmatprep.mubr.msk.bf16.mxu1 %vm2785_vm0, %v2784_v1  ;;  %2588 = vmatpush3.bf16.msra.mxu1 %v2682_v43 }
 0xc21   : > { %2589 = vmatprep.subr.bf16.mxu1 %v2784_v1 }
 0xc22   : > { %v2572_v29 = vpop.f32.mrf.mxu0 }
 0xc24   : > { %2590 = vmatpush3.bf16.msra.mxu1 %v2683_v44 }
 0xc25   : > { %2591 = vmatprep.subr.bf16.mxu1 %v2784_v1 }
 0xc28   : > { %2592 = vmatpush3.bf16.msra.mxu1 %v2684_v55 }
 0xc29   : > { %2593 = vmatprep.subr.bf16.mxu1 %v2784_v1  ;;  %v2331_v1 = vld [vmem:[%s3296_s10] ss:$0 sm:$0xff] }
 0xc2c   : > { %2594 = vmatpush3.bf16.msra.mxu1 %v2685_v56 }
 0xcdf   : > { %v1902_v30 = vpop.f32.mrf.mxu1 }
 0xce0   : > { %v1908_v31 = vadd.f32 %v1902_v30, %v1692_v2 }
 0xce1   : > { %v2577_v32 = vpop.f32.mrf.mxu1 }
 0xce2   : > { %v1909_v33 = vadd.f32 %v1908_v31, %v3027_v18  ;;  %v2681_v18 = vld [vmem:[%s3293_s7] sm:$0xff]  }
 0xce3   : > { %v1905_v34 = vpop.f32.mrf.mxu1  ;;  %2582 = vmatpush3.bf16.msra.mxu0 %v2681_v18 }
 0xce4   : > { %v1910_v35 = vsel %vm569_vm1, %v1909_v33, 0.0 }
 0xce5   : > { %1911 = vadd.xlane.f32.xlu0 %v1910_v35  ;;  %v2578_v36 = vpop.f32.mrf.mxu1 }
 0xd6e   : > { %v1912_v37 = vpop.xlane.xlu0 %1911 }
 0xd6f   : > { %v1914_v38 = vmul.f32 0.03125, %v1912_v37 }
 0xd71   : > { %v1915_v39 = vsub.f32 %v1909_v33, %v1914_v38 }
 0xd73   : > { %v1916_v40 = vmul.f32 %v1915_v39, %v1915_v39 }
 0xd75   : > { %v1917_v41 = vsel %vm569_vm1, %v1916_v40, 0.0 }
 0xd76   : > { %1918 = vadd.xlane.f32.xlu1 %v1917_v41 }
 0xdff   : > { %v1919_v45 = vpop.xlane.xlu1 %1918 }
 0xe00   : > { %v1920_v46 = vmul.f32 0.03125, %v1919_v45 }
 0xe02   : > { %v1921_v47 = vadd.f32 1e-05, %v1920_v46 }
 0xe04   : > { %2702 = vrsqrt.f32 %v1921_v47 }
 0xe11   : > { %v2703_v48 = vpop.eup %2702 }
 0xe12   : > { %v1923_v50 = vmul.f32 %v2703_v48, %v1915_v39 }
 0xe14   : > { %v1931_v52 = vmul.f32 %v2325_v49, %v1923_v50 }
 0xe16   : > { %v1939_v53 = vadd.f32 %v2326_v51, %v1931_v52 }
 0xe18   : > { %v1940_v54 = vpack.c.bf16 %v1939_v53, %v1939_v53 }
 0xe1a   : > { %2584 = vmatmul.mubr.msk.bf16.vlgmr.msra.gmra.mxu0 %vm569_vm1, %v1940_v54 }
 0xeda   : > { %v2001_v19 = vpop.f32.mrf.mxu0 }
 0xedb   : > { %v2002_v58 = vadd.f32 %v2327_v57, %v2001_v19 }
 0xedc   : > { %v2585_v59 = vpop.f32.mrf.mxu0 }
 0xedd   : > { %v2007_v60 = vmax.f32 %v2002_v58, 0.0 }
 0xede   : > { %v2004_v61 = vpop.f32.mrf.mxu0 }
 0xedf   : > { %v2008_v62 = vpack.c.bf16 %v2007_v60, %v2007_v60 }
 0xee0   : > { %v2586_v63 = vpop.f32.mrf.mxu0 }
 0xee1   : > { %2596 = vmatmul.mubr.msk.bf16.vlgmr.msra.gmra.mxu1 %vm2048_vm6, %v2008_v62 }
 0xfa1   : > { %v2086_v0 = vpop.f32.mrf.mxu1 }
 0xfa2   : > { %v2087_v2 = vadd.f32 %v2331_v1, %v2086_v0 }
 0xfa3   : > { %v2597_v3 = vpop.f32.mrf.mxu1 }
 0xfa4   : > { %v2092_v4 = vadd.f32 %v2087_v2, %v1939_v53 }
 0xfa5   : > { %v2089_v5 = vpop.f32.mrf.mxu1 }
 0xfa6   : > { %v2093_v6 = vsel %vm569_vm1, %v2092_v4, 0.0 }
 0xfa7   : > { %2094 = vadd.xlane.f32.xlu0 %v2093_v6  ;;  %v2598_v7 = vpop.f32.mrf.mxu1 }
0x1030   : > { %v2095_v8 = vpop.xlane.xlu0 %2094 }
0x1031   : > { %v2096_v9 = vmul.f32 0.03125, %v2095_v8 }
0x1033   : > { %v2097_v10 = vsub.f32 %v2092_v4, %v2096_v9 }
0x1035   : > { %v2098_v11 = vmul.f32 %v2097_v10, %v2097_v10 }
0x1037   : > { %v2099_v12 = vsel %vm569_vm1, %v2098_v11, 0.0 }
0x1038   : > { %2100 = vadd.xlane.f32.xlu1 %v2099_v12 }
0x10c1   : > { %v2101_v14 = vpop.xlane.xlu1 %2100 }
0x10c2   : > { %v2102_v15 = vmul.f32 0.03125, %v2101_v14 }
0x10c4   : > { %v2103_v16 = vadd.f32 1e-05, %v2102_v15 }
0x10c6   : > { %2704 = vrsqrt.f32 %v2103_v16 }
0x10d3   : > { %v2705_v13 = vpop.eup %2704 }
0x10d4   : > { %v2105_v20 = vmul.f32 %v2705_v13, %v2097_v10 }
0x10d6   : > { %v2113_v22 = vmul.f32 %v2337_v17, %v2105_v20 }
0x10d8   : > { %v2121_v23 = vadd.f32 %v2338_v21, %v2113_v22 }
0x10da   : > { %2122 = vst.msk [vmem:[%s531_s29] sm:$0xff] %vm569_vm1, %v2121_v23 }
0x10db   : > { %2719 = shalt.err (!%p2716_p5)
}
0x10dc   : > { %s2720_s0 = scalar_lea.hbm %s2136_s2, 128  ;;  %s2724_s16 = scalar_lea.hbm %s3301_s15, 256 }
0x10dd   : > { %p2721_p6 = scmp.ne.s32.totalorder %s2136_s2, %s2720_s0  ;;  %p2725_p10 = scmp.lt.s32.totalorder %s2136_s2, %s3301_s15 }
0x10de   : > { %p2726_p11 = scmp.lt.s32.totalorder %s2724_s16, %s2720_s0 }
0x10df   : > { %p2722_p7 = pnand %p2721_p6, %p2907_p4 }
0x10e0   : > { %p2727_p12 = por %p2726_p11, %p2725_p10 }
0x10e1   : > { %p2723_p9 = pneg %p2722_p7 }
0x10e3   : > { %p2728_p13 = pnand %p2727_p12, %p2723_p9 }
0x10e5   : > { %2731 = shalt.err (!%p2728_p13)
}
0x10e6   : > { %2599 = dma.vmem_to_hbm [thread:$0]  (%p2907_p4), %s2139_s20, 128, %s2136_s2, %s2124_s3  }
0x10e7 PF: > { %p2605_p0 = scmp.ge.s32.totalorder %s2782_s23, 2  ;;  %s2150_s29 = sand.u32 1, %s2762_s18  }
0x10e8   : > { %s2151_s24 = scalar_lea.sflag [#allocation5], %s2150_s29 }
0x10e9   : > { %p2602_p1 = pnand %p2605_p0, %p2914_p8 }
0x10eb   : > { %p2603_p2 = pneg %p2602_p1 }
0x10ed   : > { %2757 = dma.done.wait (%p2603_p2), %s2151_s24, 128  }
0x10ee   : > { %2759 = vsyncadd (%p2603_p2), %s2151_s24, 4294967168  ;;  %s28_s23 = sadd.s32 1, %s2782_s23   ;;  %s3321_s25 = sld [smem:[#allocation7_spill]] }
0x10ef   : > { %p25_p3 = scmp.ge.s32.totalorder %s28_s23, 4   ;;  %s3322_s20 = sld [smem:[#allocation10_spill]] }
0x10f0   : > { %s3323_s21 = sld [smem:[#allocation8_spill]]  ;;  %s3325_s18 = smov %s2766_s19 }
0x10f1   : > { %s3324_s22 = sld [smem:[#allocation9_spill]]  ;;  %27 = sbr.rel (!%p25_p3) target bundleno = 9 (0x9), region = 149 }
0x10f4   : > { %s3326_s19 = smov %s3321_s25 }
0x10f6   :  { %2156 = vsyncpa [#allocation5], 1 }
0x10f7   :  { %2158 = vsyncpa [#allocation5 + $0x1], 1 }

</bundles_post_ra>
